<compile_context>
chip_gen: v6e
topology: v6e:2x2x1
jax: 0.10.0
libtpu: 0.0.40
codegen_flags: <defaults>
</compile_context>

<pallas_src>
import math

import jax
import jax.numpy as jnp
import numpy as np
from jax.experimental import pallas as pl
from jax.experimental.pallas import tpu as pltpu

# --- model config (small, consistent with a tiny decoder-only LM) ------------
B, S, D = 2, 8, 32          # batch, seq, hidden
BS = B * S                  # batch folded into rows
H = 4                       # attention heads
HD = D // H                 # head dim
MLP = 64                    # MLP hidden
V = 128                     # vocab size (lane-dense output)
N_LAYERS = 2
MAX_POS = 64

PER_LAYER = 12
N_WEIGHTS = N_LAYERS * PER_LAYER + 4


def _ln(x, g, b, eps=1e-5):
    mu = jnp.mean(x, axis=-1, keepdims=True)
    var = jnp.mean(jnp.square(x - mu), axis=-1, keepdims=True)
    return (x - mu) * jax.lax.rsqrt(var + eps) * g + b


# --- fused Pallas kernel: all layers + final LN + LM head --------------------
def _fused_kernel(*refs):
    x_ref, bias_ref = refs[0], refs[1]
    wrefs = refs[2:2 + N_WEIGHTS]
    o_ref = refs[2 + N_WEIGHTS]
    attn_scr = refs[2 + N_WEIGHTS + 1]          # VMEM (BS, D) f32 scratch

    x = x_ref[...]                               # (BS, D) f32
    bias = bias_ref[...]                         # (BS, BS) f32 additive mask
    scale = 1.0 / math.sqrt(HD)

    for l in range(N_LAYERS):                    # static unroll, weights resident
        (ln1_g, ln1_b, wq, wk, wv, wo,
         ln2_g, ln2_b, w1, b1, w2, b2) = wrefs[l * PER_LAYER:(l + 1) * PER_LAYER]

        # --- self-attention ---
        h = _ln(x, ln1_g[...], ln1_b[...]).astype(jnp.bfloat16)
        q = jnp.dot(h, wq[...], preferred_element_type=jnp.float32)   # (BS, D)
        k = jnp.dot(h, wk[...], preferred_element_type=jnp.float32)
        v = jnp.dot(h, wv[...], preferred_element_type=jnp.float32)

        for hh in range(H):                       # static head loop
            sl = slice(hh * HD, (hh + 1) * HD)
            qh, kh, vh = q[:, sl], k[:, sl], v[:, sl]
            s = jnp.dot(qh, kh.T, preferred_element_type=jnp.float32) * scale + bias
            m = jnp.max(s, axis=-1, keepdims=True)
            e = jnp.exp(s - m)
            inv = pl.reciprocal(jnp.sum(e, axis=-1, keepdims=True), approx=True)
            attn_scr[:, sl] = jnp.dot(e * inv, vh,
                                      preferred_element_type=jnp.float32)

        # single (BS,D)@(D,D) output projection over the re-assembled heads
        attn = jnp.dot(attn_scr[...].astype(jnp.bfloat16), wo[...],
                       preferred_element_type=jnp.float32)
        x = x + attn

        # --- MLP ---
        h2 = _ln(x, ln2_g[...], ln2_b[...]).astype(jnp.bfloat16)
        m1 = jax.nn.gelu(
            jnp.dot(h2, w1[...], preferred_element_type=jnp.float32) + b1[...],
            approximate=True).astype(jnp.bfloat16)
        x = x + jnp.dot(m1, w2[...], preferred_element_type=jnp.float32) + b2[...]

    # --- final LN + LM head (only HBM store, lane-dense V=128) ---
    lnf_g, lnf_b, lm_w, lm_b = wrefs[N_LAYERS * PER_LAYER:]
    hf = _ln(x, lnf_g[...], lnf_b[...]).astype(jnp.bfloat16)
    o_ref[...] = jnp.dot(hf, lm_w[...], preferred_element_type=jnp.float32) + lm_b[...]


# --- pallas_call wrapper ------------------------------------------------------
def _full_spec(shape):
    nd = len(shape)
    return pl.BlockSpec(shape, lambda i, _nd=nd: (0,) * _nd)


def _build_attn_bias(attention_mask):
    """(BS, BS) additive bias: 0 where attend allowed, -1e30 otherwise."""
    bidx = jnp.arange(BS, dtype=jnp.int32) // S
    sidx = jnp.arange(BS, dtype=jnp.int32) % S
    same_batch = bidx[:, None] == bidx[None, :]
    causal = sidx[None, :] <= sidx[:, None]
    key_valid = (attention_mask.reshape(BS) > 0)[None, :]
    allow = same_batch & causal & key_valid
    return jnp.where(allow, 0.0, -1e30).astype(jnp.float32)


def lm_sampler_forward(params, input_ids, attention_mask, input_pos):
    """Equivalent of LMSampler.forward -> logits (B, S, V)."""
    x = params['tok_emb'][input_ids] + params['pos_emb'][input_pos][None, :, :]
    x = x.reshape(BS, D).astype(jnp.float32)
    bias = _build_attn_bias(attention_mask)

    weights = []
    for lp in params['layers']:
        weights += [lp['ln1_g'], lp['ln1_b'], lp['wq'], lp['wk'], lp['wv'], lp['wo'],
                    lp['ln2_g'], lp['ln2_b'], lp['w1'], lp['b1'], lp['w2'], lp['b2']]
    weights += [params['lnf_g'], params['lnf_b'], params['lm_w'], params['lm_b']]

    in_specs = ([_full_spec((BS, D)), _full_spec((BS, BS))]
                + [_full_spec(tuple(w.shape)) for w in weights])

    # NOTE(v7x): with batch folded into rows there is no grid axis to shard
    # across the 2 TensorCores; at this size the kernel is launch-bound and a
    # single fused invocation is the right call on v5e/v6e/v7x alike.
    logits = pl.pallas_call(
        _fused_kernel,
        out_shape=jax.ShapeDtypeStruct((BS, V), jnp.float32),
        grid_spec=pltpu.PrefetchScalarGridSpec(
            num_scalar_prefetch=0,
            grid=(1,),
            in_specs=in_specs,
            out_specs=_full_spec((BS, V)),
            scratch_shapes=[pltpu.VMEM((BS, D), jnp.float32)]),
        compiler_params=pltpu.CompilerParams(
            dimension_semantics=("arbitrary",)),
    )(x, bias, *weights)
    return logits.reshape(B, S, V)


# --- pure-JAX f32 reference (same math, no Pallas) for a correctness check ----
def forward_ref(params, input_ids, attention_mask, input_pos):
    f32 = lambda a: a.astype(jnp.float32)
    x = params['tok_emb'][input_ids] + params['pos_emb'][input_pos][None, :, :]
    am = attention_mask.astype(jnp.float32)                  # (B, S)
    row = jax.lax.broadcasted_iota(jnp.int32, (S, S), 0)
    col = jax.lax.broadcasted_iota(jnp.int32, (S, S), 1)
    allow = jnp.logical_and((col <= row)[None], am[:, None, :] > 0.5)  # (B,S,S)
    scale = 1.0 / math.sqrt(HD)
    for lp in params['layers']:
        h = _ln(x, f32(lp['ln1_g']), f32(lp['ln1_b']))
        q = h @ f32(lp['wq']); k = h @ f32(lp['wk']); v = h @ f32(lp['wv'])
        heads = []
        for hh in range(H):
            sl = slice(hh * HD, (hh + 1) * HD)
            s = jnp.einsum('bqd,bkd->bqk', q[..., sl], k[..., sl]) * scale
            s = jnp.where(allow, s, -1e30)
            m = jnp.max(s, axis=-1, keepdims=True)
            e = jnp.exp(s - m)
            p = e / jnp.sum(e, axis=-1, keepdims=True)
            heads.append(jnp.einsum('bqk,bkd->bqd', p, v[..., sl]))
        x = x + jnp.concatenate(heads, axis=-1) @ f32(lp['wo'])
        h2 = _ln(x, f32(lp['ln2_g']), f32(lp['ln2_b']))
        x = x + jax.nn.gelu(h2 @ f32(lp['w1']) + f32(lp['b1']),
                            approximate=True) @ f32(lp['w2']) + f32(lp['b2'])
    h = _ln(x, f32(params['lnf_g']), f32(params['lnf_b']))
    return h @ f32(params['lm_w']) + f32(params['lm_b'])


# --- deterministic parameter init ---------------------------------------------
def init_params(key):
    ks = iter(jax.random.split(key, 64))

    def nrm(shape, scale=0.02, dtype=jnp.bfloat16):
        return (scale * jax.random.normal(next(ks), shape)).astype(dtype)

    params = {
        'tok_emb': nrm((V, D), dtype=jnp.float32),
        'pos_emb': nrm((MAX_POS, D), dtype=jnp.float32),
        'lnf_g': jnp.ones((1, D), jnp.float32),
        'lnf_b': jnp.zeros((1, D), jnp.float32),
        'lm_w': nrm((D, V)),                       # bf16 (halves weight DMA bytes)
        'lm_b': jnp.zeros((1, V), jnp.float32),
        'layers': [],
    }
    for _ in range(N_LAYERS):
        params['layers'].append({
            'ln1_g': jnp.ones((1, D), jnp.float32),
            'ln1_b': jnp.zeros((1, D), jnp.float32),
            'wq': nrm((D, D)), 'wk': nrm((D, D)),
            'wv': nrm((D, D)), 'wo': nrm((D, D)),
            'ln2_g': jnp.ones((1, D), jnp.float32),
            'ln2_b': jnp.zeros((1, D), jnp.float32),
            'w1': nrm((D, MLP)), 'b1': jnp.zeros((1, MLP), jnp.float32),
            'w2': nrm((MLP, D)), 'b2': jnp.zeros((1, D), jnp.float32),
        })
    return params


if __name__ == "__main__":
    key = jax.random.PRNGKey(0)
    pkey, dkey = jax.random.split(key)
    params = init_params(pkey)

    input_ids = jax.random.randint(dkey, (B, S), 0, V, dtype=jnp.int32)
    attention_mask = jnp.ones((B, S), dtype=jnp.int32)
    input_pos = jnp.arange(S, dtype=jnp.int32)

    logits = lm_sampler_forward(params, input_ids, attention_mask, input_pos)
    logits = jax.block_until_ready(logits)
    assert logits.shape == (B, S, V) and logits.dtype == jnp.float32

    ref = forward_ref(params, input_ids, attention_mask, input_pos)
    # Kernel uses bf16 MXU operands + approx reciprocal; reference is pure f32.
    np.testing.assert_allclose(np.asarray(logits), np.asarray(ref),
                               rtol=2e-2, atol=2e-2)
    print("KERNEL_OK")
</pallas_src>

<mosaic_0001>
module attributes {stable_mosaic.version = 11 : i64} {
  func.func @_fused_kernel(%arg0: i32, %arg1: memref<16x32xf32, #tpu.memory_space<vmem>>, %arg2: memref<16x16xf32, #tpu.memory_space<vmem>>, %arg3: memref<1x32xf32, #tpu.memory_space<vmem>>, %arg4: memref<1x32xf32, #tpu.memory_space<vmem>>, %arg5: memref<32x32xbf16, #tpu.memory_space<vmem>>, %arg6: memref<32x32xbf16, #tpu.memory_space<vmem>>, %arg7: memref<32x32xbf16, #tpu.memory_space<vmem>>, %arg8: memref<32x32xbf16, #tpu.memory_space<vmem>>, %arg9: memref<1x32xf32, #tpu.memory_space<vmem>>, %arg10: memref<1x32xf32, #tpu.memory_space<vmem>>, %arg11: memref<32x64xbf16, #tpu.memory_space<vmem>>, %arg12: memref<1x64xf32, #tpu.memory_space<vmem>>, %arg13: memref<64x32xbf16, #tpu.memory_space<vmem>>, %arg14: memref<1x32xf32, #tpu.memory_space<vmem>>, %arg15: memref<1x32xf32, #tpu.memory_space<vmem>>, %arg16: memref<1x32xf32, #tpu.memory_space<vmem>>, %arg17: memref<32x32xbf16, #tpu.memory_space<vmem>>, %arg18: memref<32x32xbf16, #tpu.memory_space<vmem>>, %arg19: memref<32x32xbf16, #tpu.memory_space<vmem>>, %arg20: memref<32x32xbf16, #tpu.memory_space<vmem>>, %arg21: memref<1x32xf32, #tpu.memory_space<vmem>>, %arg22: memref<1x32xf32, #tpu.memory_space<vmem>>, %arg23: memref<32x64xbf16, #tpu.memory_space<vmem>>, %arg24: memref<1x64xf32, #tpu.memory_space<vmem>>, %arg25: memref<64x32xbf16, #tpu.memory_space<vmem>>, %arg26: memref<1x32xf32, #tpu.memory_space<vmem>>, %arg27: memref<1x32xf32, #tpu.memory_space<vmem>>, %arg28: memref<1x32xf32, #tpu.memory_space<vmem>>, %arg29: memref<32x128xbf16, #tpu.memory_space<vmem>>, %arg30: memref<1x128xf32, #tpu.memory_space<vmem>>, %arg31: memref<16x128xf32, #tpu.memory_space<vmem>>, %arg32: memref<16x32xf32, #tpu.memory_space<vmem>>) attributes {dimension_semantics = [#tpu.dimension_semantics<arbitrary>], iteration_bounds = array<i64: 1>, scalar_prefetch = 0 : i64, scratch_operands = 1 : i64, tpu.core_type = #tpu.core_type<tc>, window_params = [{pipeline_mode = #tpu.pipeline_mode<synchronous>, transform_indices = @transform_0, window_bounds = array<i64: 16, 32>}, {pipeline_mode = #tpu.pipeline_mode<synchronous>, transform_indices = @transform_1, window_bounds = array<i64: 16, 16>}, {pipeline_mode = #tpu.pipeline_mode<synchronous>, transform_indices = @transform_2, window_bounds = array<i64: 1, 32>}, {pipeline_mode = #tpu.pipeline_mode<synchronous>, transform_indices = @transform_3, window_bounds = array<i64: 1, 32>}, {pipeline_mode = #tpu.pipeline_mode<synchronous>, transform_indices = @transform_4, window_bounds = array<i64: 32, 32>}, {pipeline_mode = #tpu.pipeline_mode<synchronous>, transform_indices = @transform_5, window_bounds = array<i64: 32, 32>}, {pipeline_mode = #tpu.pipeline_mode<synchronous>, transform_indices = @transform_6, window_bounds = array<i64: 32, 32>}, {pipeline_mode = #tpu.pipeline_mode<synchronous>, transform_indices = @transform_7, window_bounds = array<i64: 32, 32>}, {pipeline_mode = #tpu.pipeline_mode<synchronous>, transform_indices = @transform_8, window_bounds = array<i64: 1, 32>}, {pipeline_mode = #tpu.pipeline_mode<synchronous>, transform_indices = @transform_9, window_bounds = array<i64: 1, 32>}, {pipeline_mode = #tpu.pipeline_mode<synchronous>, transform_indices = @transform_10, window_bounds = array<i64: 32, 64>}, {pipeline_mode = #tpu.pipeline_mode<synchronous>, transform_indices = @transform_11, window_bounds = array<i64: 1, 64>}, {pipeline_mode = #tpu.pipeline_mode<synchronous>, transform_indices = @transform_12, window_bounds = array<i64: 64, 32>}, {pipeline_mode = #tpu.pipeline_mode<synchronous>, transform_indices = @transform_13, window_bounds = array<i64: 1, 32>}, {pipeline_mode = #tpu.pipeline_mode<synchronous>, transform_indices = @transform_14, window_bounds = array<i64: 1, 32>}, {pipeline_mode = #tpu.pipeline_mode<synchronous>, transform_indices = @transform_15, window_bounds = array<i64: 1, 32>}, {pipeline_mode = #tpu.pipeline_mode<synchronous>, transform_indices = @transform_16, window_bounds = array<i64: 32, 32>}, {pipeline_mode = #tpu.pipeline_mode<synchronous>, transform_indices = @transform_17, window_bounds = array<i64: 32, 32>}, {pipeline_mode = #tpu.pipeline_mode<synchronous>, transform_indices = @transform_18, window_bounds = array<i64: 32, 32>}, {pipeline_mode = #tpu.pipeline_mode<synchronous>, transform_indices = @transform_19, window_bounds = array<i64: 32, 32>}, {pipeline_mode = #tpu.pipeline_mode<synchronous>, transform_indices = @transform_20, window_bounds = array<i64: 1, 32>}, {pipeline_mode = #tpu.pipeline_mode<synchronous>, transform_indices = @transform_21, window_bounds = array<i64: 1, 32>}, {pipeline_mode = #tpu.pipeline_mode<synchronous>, transform_indices = @transform_22, window_bounds = array<i64: 32, 64>}, {pipeline_mode = #tpu.pipeline_mode<synchronous>, transform_indices = @transform_23, window_bounds = array<i64: 1, 64>}, {pipeline_mode = #tpu.pipeline_mode<synchronous>, transform_indices = @transform_24, window_bounds = array<i64: 64, 32>}, {pipeline_mode = #tpu.pipeline_mode<synchronous>, transform_indices = @transform_25, window_bounds = array<i64: 1, 32>}, {pipeline_mode = #tpu.pipeline_mode<synchronous>, transform_indices = @transform_26, window_bounds = array<i64: 1, 32>}, {pipeline_mode = #tpu.pipeline_mode<synchronous>, transform_indices = @transform_27, window_bounds = array<i64: 1, 32>}, {pipeline_mode = #tpu.pipeline_mode<synchronous>, transform_indices = @transform_28, window_bounds = array<i64: 32, 128>}, {pipeline_mode = #tpu.pipeline_mode<synchronous>, transform_indices = @transform_29, window_bounds = array<i64: 1, 128>}, {pipeline_mode = #tpu.pipeline_mode<synchronous>, transform_indices = @transform_30, window_bounds = array<i64: 16, 128>}]} {
    %c0 = arith.constant 0 : index
    %c0_0 = arith.constant 0 : index
    %0 = vector.load %arg1[%c0, %c0_0] : memref<16x32xf32, #tpu.memory_space<vmem>>, vector<16x32xf32>
    %c0_1 = arith.constant 0 : index
    %c0_2 = arith.constant 0 : index
    %1 = vector.load %arg2[%c0_1, %c0_2] : memref<16x16xf32, #tpu.memory_space<vmem>>, vector<16x16xf32>
    %c0_3 = arith.constant 0 : index
    %c0_4 = arith.constant 0 : index
    %2 = vector.load %arg3[%c0_3, %c0_4] : memref<1x32xf32, #tpu.memory_space<vmem>>, vector<1x32xf32>
    %c0_5 = arith.constant 0 : index
    %c0_6 = arith.constant 0 : index
    %3 = vector.load %arg4[%c0_5, %c0_6] : memref<1x32xf32, #tpu.memory_space<vmem>>, vector<1x32xf32>
    %cst = arith.constant dense<0.000000e+00> : vector<16xf32>
    %4 = vector.multi_reduction <add>, %0, %cst [1] : vector<16x32xf32> to vector<16xf32>
    %5 = vector.shape_cast %4 : vector<16xf32> to vector<16x1xf32>
    %cst_7 = arith.constant 3.200000e+01 : f32
    %6 = vector.broadcast %cst_7 : f32 to vector<16x1xf32>
    %7 = arith.divf %5, %6 : vector<16x1xf32>
    %8 = vector.broadcast %7 : vector<16x1xf32> to vector<16x32xf32>
    %9 = arith.subf %0, %8 : vector<16x32xf32>
    %10 = arith.mulf %9, %9 : vector<16x32xf32>
    %cst_8 = arith.constant dense<0.000000e+00> : vector<16xf32>
    %11 = vector.multi_reduction <add>, %10, %cst_8 [1] : vector<16x32xf32> to vector<16xf32>
    %12 = vector.shape_cast %11 : vector<16xf32> to vector<16x1xf32>
    %cst_9 = arith.constant 3.200000e+01 : f32
    %13 = vector.broadcast %cst_9 : f32 to vector<16x1xf32>
    %14 = arith.divf %12, %13 : vector<16x1xf32>
    %15 = vector.broadcast %7 : vector<16x1xf32> to vector<16x32xf32>
    %16 = arith.subf %0, %15 : vector<16x32xf32>
    %cst_10 = arith.constant 9.99999974E-6 : f32
    %17 = vector.broadcast %cst_10 : f32 to vector<16x1xf32>
    %18 = arith.addf %14, %17 : vector<16x1xf32>
    %19 = math.rsqrt %18 : vector<16x1xf32>
    %20 = vector.broadcast %19 : vector<16x1xf32> to vector<16x32xf32>
    %21 = arith.mulf %16, %20 : vector<16x32xf32>
    %22 = vector.broadcast %2 : vector<1x32xf32> to vector<16x32xf32>
    %23 = arith.mulf %21, %22 : vector<16x32xf32>
    %24 = vector.broadcast %3 : vector<1x32xf32> to vector<16x32xf32>
    %25 = arith.addf %23, %24 : vector<16x32xf32>
    %26 = arith.truncf %25 : vector<16x32xf32> to vector<16x32xbf16>
    %c0_11 = arith.constant 0 : index
    %c0_12 = arith.constant 0 : index
    %27 = vector.load %arg5[%c0_11, %c0_12] : memref<32x32xbf16, #tpu.memory_space<vmem>>, vector<32x32xbf16>
    %cst_13 = arith.constant dense<0.000000e+00> : vector<16x32xf32>
    %28 = tpu.matmul %26, %27, %cst_13 {dimension_numbers = #tpu.dot_dimension_numbers<[1], [0], [0], [1], [0, 0, 1, 1], [], []>} : vector<16x32xbf16>, vector<32x32xbf16>, vector<16x32xf32> -> vector<16x32xf32>
    %c0_14 = arith.constant 0 : index
    %c0_15 = arith.constant 0 : index
    %29 = vector.load %arg6[%c0_14, %c0_15] : memref<32x32xbf16, #tpu.memory_space<vmem>>, vector<32x32xbf16>
    %cst_16 = arith.constant dense<0.000000e+00> : vector<16x32xf32>
    %30 = tpu.matmul %26, %29, %cst_16 {dimension_numbers = #tpu.dot_dimension_numbers<[1], [0], [0], [1], [0, 0, 1, 1], [], []>} : vector<16x32xbf16>, vector<32x32xbf16>, vector<16x32xf32> -> vector<16x32xf32>
    %c0_17 = arith.constant 0 : index
    %c0_18 = arith.constant 0 : index
    %31 = vector.load %arg7[%c0_17, %c0_18] : memref<32x32xbf16, #tpu.memory_space<vmem>>, vector<32x32xbf16>
    %cst_19 = arith.constant dense<0.000000e+00> : vector<16x32xf32>
    %32 = tpu.matmul %26, %31, %cst_19 {dimension_numbers = #tpu.dot_dimension_numbers<[1], [0], [0], [1], [0, 0, 1, 1], [], []>} : vector<16x32xbf16>, vector<32x32xbf16>, vector<16x32xf32> -> vector<16x32xf32>
    %33 = vector.extract_strided_slice %28 {offsets = [0, 0], sizes = [16, 8], strides = [1, 1]} : vector<16x32xf32> to vector<16x8xf32>
    %34 = vector.extract_strided_slice %30 {offsets = [0, 0], sizes = [16, 8], strides = [1, 1]} : vector<16x32xf32> to vector<16x8xf32>
    %35 = vector.extract_strided_slice %32 {offsets = [0, 0], sizes = [16, 8], strides = [1, 1]} : vector<16x32xf32> to vector<16x8xf32>
    %36 = tpu.transpose %34, [1, 0] : vector<16x8xf32> -> vector<8x16xf32>
    %cst_20 = arith.constant dense<0.000000e+00> : vector<16x16xf32>
    %37 = tpu.matmul %33, %36, %cst_20 {dimension_numbers = #tpu.dot_dimension_numbers<[1], [0], [0], [1], [0, 0, 1, 1], [], []>} : vector<16x8xf32>, vector<8x16xf32>, vector<16x16xf32> -> vector<16x16xf32>
    %cst_21 = arith.constant 0.353553385 : f32
    %38 = vector.broadcast %cst_21 : f32 to vector<16x16xf32>
    %39 = arith.mulf %37, %38 : vector<16x16xf32>
    %40 = arith.addf %39, %1 : vector<16x16xf32>
    %cst_22 = arith.constant dense<0xFF800000> : vector<16xf32>
    %41 = vector.multi_reduction <maximumf>, %40, %cst_22 [1] : vector<16x16xf32> to vector<16xf32>
    %42 = vector.shape_cast %41 : vector<16xf32> to vector<16x1xf32>
    %43 = vector.broadcast %42 : vector<16x1xf32> to vector<16x16xf32>
    %44 = arith.subf %40, %43 : vector<16x16xf32>
    %45 = math.exp %44 : vector<16x16xf32>
    %cst_23 = arith.constant dense<0.000000e+00> : vector<16xf32>
    %46 = vector.multi_reduction <add>, %45, %cst_23 [1] : vector<16x16xf32> to vector<16xf32>
    %47 = vector.shape_cast %46 : vector<16xf32> to vector<16x1xf32>
    %48 = tpu.reciprocal %47 {approx = true} : vector<16x1xf32> -> vector<16x1xf32>
    %49 = vector.broadcast %48 : vector<16x1xf32> to vector<16x16xf32>
    %50 = arith.mulf %45, %49 : vector<16x16xf32>
    %cst_24 = arith.constant dense<0.000000e+00> : vector<16x8xf32>
    %51 = tpu.matmul %50, %35, %cst_24 {dimension_numbers = #tpu.dot_dimension_numbers<[1], [0], [0], [1], [0, 0, 1, 1], [], []>} : vector<16x16xf32>, vector<16x8xf32>, vector<16x8xf32> -> vector<16x8xf32>
    %c0_25 = arith.constant 0 : index
    %c0_26 = arith.constant 0 : index
    %52 = vector.load %arg32[%c0_25, %c0_26] : memref<16x32xf32, #tpu.memory_space<vmem>>, vector<16x8xf32>
    tpu.vector_store %arg32[%c0_25, %c0_26], %51 {strides = array<i32>} : memref<16x32xf32, #tpu.memory_space<vmem>>, vector<16x8xf32>,
    %53 = vector.extract_strided_slice %28 {offsets = [0, 8], sizes = [16, 8], strides = [1, 1]} : vector<16x32xf32> to vector<16x8xf32>
    %54 = vector.extract_strided_slice %30 {offsets = [0, 8], sizes = [16, 8], strides = [1, 1]} : vector<16x32xf32> to vector<16x8xf32>
    %55 = vector.extract_strided_slice %32 {offsets = [0, 8], sizes = [16, 8], strides = [1, 1]} : vector<16x32xf32> to vector<16x8xf32>
    %56 = tpu.transpose %54, [1, 0] : vector<16x8xf32> -> vector<8x16xf32>
    %cst_27 = arith.constant dense<0.000000e+00> : vector<16x16xf32>
    %57 = tpu.matmul %53, %56, %cst_27 {dimension_numbers = #tpu.dot_dimension_numbers<[1], [0], [0], [1], [0, 0, 1, 1], [], []>} : vector<16x8xf32>, vector<8x16xf32>, vector<16x16xf32> -> vector<16x16xf32>
    %cst_28 = arith.constant 0.353553385 : f32
    %58 = vector.broadcast %cst_28 : f32 to vector<16x16xf32>
    %59 = arith.mulf %57, %58 : vector<16x16xf32>
    %60 = arith.addf %59, %1 : vector<16x16xf32>
    %cst_29 = arith.constant dense<0xFF800000> : vector<16xf32>
    %61 = vector.multi_reduction <maximumf>, %60, %cst_29 [1] : vector<16x16xf32> to vector<16xf32>
    %62 = vector.shape_cast %61 : vector<16xf32> to vector<16x1xf32>
    %63 = vector.broadcast %62 : vector<16x1xf32> to vector<16x16xf32>
    %64 = arith.subf %60, %63 : vector<16x16xf32>
    %65 = math.exp %64 : vector<16x16xf32>
    %cst_30 = arith.constant dense<0.000000e+00> : vector<16xf32>
    %66 = vector.multi_reduction <add>, %65, %cst_30 [1] : vector<16x16xf32> to vector<16xf32>
    %67 = vector.shape_cast %66 : vector<16xf32> to vector<16x1xf32>
    %68 = tpu.reciprocal %67 {approx = true} : vector<16x1xf32> -> vector<16x1xf32>
    %69 = vector.broadcast %68 : vector<16x1xf32> to vector<16x16xf32>
    %70 = arith.mulf %65, %69 : vector<16x16xf32>
    %cst_31 = arith.constant dense<0.000000e+00> : vector<16x8xf32>
    %71 = tpu.matmul %70, %55, %cst_31 {dimension_numbers = #tpu.dot_dimension_numbers<[1], [0], [0], [1], [0, 0, 1, 1], [], []>} : vector<16x16xf32>, vector<16x8xf32>, vector<16x8xf32> -> vector<16x8xf32>
    %c0_32 = arith.constant 0 : index
    %c8 = arith.constant 8 : index
    %72 = vector.load %arg32[%c0_32, %c8] : memref<16x32xf32, #tpu.memory_space<vmem>>, vector<16x8xf32>
    tpu.vector_store %arg32[%c0_32, %c8], %71 {strides = array<i32>} : memref<16x32xf32, #tpu.memory_space<vmem>>, vector<16x8xf32>,
    %73 = vector.extract_strided_slice %28 {offsets = [0, 16], sizes = [16, 8], strides = [1, 1]} : vector<16x32xf32> to vector<16x8xf32>
    %74 = vector.extract_strided_slice %30 {offsets = [0, 16], sizes = [16, 8], strides = [1, 1]} : vector<16x32xf32> to vector<16x8xf32>
    %75 = vector.extract_strided_slice %32 {offsets = [0, 16], sizes = [16, 8], strides = [1, 1]} : vector<16x32xf32> to vector<16x8xf32>
    %76 = tpu.transpose %74, [1, 0] : vector<16x8xf32> -> vector<8x16xf32>
    %cst_33 = arith.constant dense<0.000000e+00> : vector<16x16xf32>
    %77 = tpu.matmul %73, %76, %cst_33 {dimension_numbers = #tpu.dot_dimension_numbers<[1], [0], [0], [1], [0, 0, 1, 1], [], []>} : vector<16x8xf32>, vector<8x16xf32>, vector<16x16xf32> -> vector<16x16xf32>
    %cst_34 = arith.constant 0.353553385 : f32
    %78 = vector.broadcast %cst_34 : f32 to vector<16x16xf32>
    %79 = arith.mulf %77, %78 : vector<16x16xf32>
    %80 = arith.addf %79, %1 : vector<16x16xf32>
    %cst_35 = arith.constant dense<0xFF800000> : vector<16xf32>
    %81 = vector.multi_reduction <maximumf>, %80, %cst_35 [1] : vector<16x16xf32> to vector<16xf32>
    %82 = vector.shape_cast %81 : vector<16xf32> to vector<16x1xf32>
    %83 = vector.broadcast %82 : vector<16x1xf32> to vector<16x16xf32>
    %84 = arith.subf %80, %83 : vector<16x16xf32>
    %85 = math.exp %84 : vector<16x16xf32>
    %cst_36 = arith.constant dense<0.000000e+00> : vector<16xf32>
    %86 = vector.multi_reduction <add>, %85, %cst_36 [1] : vector<16x16xf32> to vector<16xf32>
    %87 = vector.shape_cast %86 : vector<16xf32> to vector<16x1xf32>
    %88 = tpu.reciprocal %87 {approx = true} : vector<16x1xf32> -> vector<16x1xf32>
    %89 = vector.broadcast %88 : vector<16x1xf32> to vector<16x16xf32>
    %90 = arith.mulf %85, %89 : vector<16x16xf32>
    %cst_37 = arith.constant dense<0.000000e+00> : vector<16x8xf32>
    %91 = tpu.matmul %90, %75, %cst_37 {dimension_numbers = #tpu.dot_dimension_numbers<[1], [0], [0], [1], [0, 0, 1, 1], [], []>} : vector<16x16xf32>, vector<16x8xf32>, vector<16x8xf32> -> vector<16x8xf32>
    %c0_38 = arith.constant 0 : index
    %c16 = arith.constant 16 : index
    %92 = vector.load %arg32[%c0_38, %c16] : memref<16x32xf32, #tpu.memory_space<vmem>>, vector<16x8xf32>
    tpu.vector_store %arg32[%c0_38, %c16], %91 {strides = array<i32>} : memref<16x32xf32, #tpu.memory_space<vmem>>, vector<16x8xf32>,
    %93 = vector.extract_strided_slice %28 {offsets = [0, 24], sizes = [16, 8], strides = [1, 1]} : vector<16x32xf32> to vector<16x8xf32>
    %94 = vector.extract_strided_slice %30 {offsets = [0, 24], sizes = [16, 8], strides = [1, 1]} : vector<16x32xf32> to vector<16x8xf32>
    %95 = vector.extract_strided_slice %32 {offsets = [0, 24], sizes = [16, 8], strides = [1, 1]} : vector<16x32xf32> to vector<16x8xf32>
    %96 = tpu.transpose %94, [1, 0] : vector<16x8xf32> -> vector<8x16xf32>
    %cst_39 = arith.constant dense<0.000000e+00> : vector<16x16xf32>
    %97 = tpu.matmul %93, %96, %cst_39 {dimension_numbers = #tpu.dot_dimension_numbers<[1], [0], [0], [1], [0, 0, 1, 1], [], []>} : vector<16x8xf32>, vector<8x16xf32>, vector<16x16xf32> -> vector<16x16xf32>
    %cst_40 = arith.constant 0.353553385 : f32
    %98 = vector.broadcast %cst_40 : f32 to vector<16x16xf32>
    %99 = arith.mulf %97, %98 : vector<16x16xf32>
    %100 = arith.addf %99, %1 : vector<16x16xf32>
    %cst_41 = arith.constant dense<0xFF800000> : vector<16xf32>
    %101 = vector.multi_reduction <maximumf>, %100, %cst_41 [1] : vector<16x16xf32> to vector<16xf32>
    %102 = vector.shape_cast %101 : vector<16xf32> to vector<16x1xf32>
    %103 = vector.broadcast %102 : vector<16x1xf32> to vector<16x16xf32>
    %104 = arith.subf %100, %103 : vector<16x16xf32>
    %105 = math.exp %104 : vector<16x16xf32>
    %cst_42 = arith.constant dense<0.000000e+00> : vector<16xf32>
    %106 = vector.multi_reduction <add>, %105, %cst_42 [1] : vector<16x16xf32> to vector<16xf32>
    %107 = vector.shape_cast %106 : vector<16xf32> to vector<16x1xf32>
    %108 = tpu.reciprocal %107 {approx = true} : vector<16x1xf32> -> vector<16x1xf32>
    %109 = vector.broadcast %108 : vector<16x1xf32> to vector<16x16xf32>
    %110 = arith.mulf %105, %109 : vector<16x16xf32>
    %cst_43 = arith.constant dense<0.000000e+00> : vector<16x8xf32>
    %111 = tpu.matmul %110, %95, %cst_43 {dimension_numbers = #tpu.dot_dimension_numbers<[1], [0], [0], [1], [0, 0, 1, 1], [], []>} : vector<16x16xf32>, vector<16x8xf32>, vector<16x8xf32> -> vector<16x8xf32>
    %c0_44 = arith.constant 0 : index
    %c24 = arith.constant 24 : index
    %112 = vector.load %arg32[%c0_44, %c24] : memref<16x32xf32, #tpu.memory_space<vmem>>, vector<16x8xf32>
    tpu.vector_store %arg32[%c0_44, %c24], %111 {strides = array<i32>} : memref<16x32xf32, #tpu.memory_space<vmem>>, vector<16x8xf32>,
    %c0_45 = arith.constant 0 : index
    %c0_46 = arith.constant 0 : index
    %113 = vector.load %arg32[%c0_45, %c0_46] : memref<16x32xf32, #tpu.memory_space<vmem>>, vector<16x32xf32>
    %114 = arith.truncf %113 : vector<16x32xf32> to vector<16x32xbf16>
    %c0_47 = arith.constant 0 : index
    %c0_48 = arith.constant 0 : index
    %115 = vector.load %arg8[%c0_47, %c0_48] : memref<32x32xbf16, #tpu.memory_space<vmem>>, vector<32x32xbf16>
    %cst_49 = arith.constant dense<0.000000e+00> : vector<16x32xf32>
    %116 = tpu.matmul %114, %115, %cst_49 {dimension_numbers = #tpu.dot_dimension_numbers<[1], [0], [0], [1], [0, 0, 1, 1], [], []>} : vector<16x32xbf16>, vector<32x32xbf16>, vector<16x32xf32> -> vector<16x32xf32>
    %117 = arith.addf %0, %116 : vector<16x32xf32>
    %c0_50 = arith.constant 0 : index
    %c0_51 = arith.constant 0 : index
    %118 = vector.load %arg9[%c0_50, %c0_51] : memref<1x32xf32, #tpu.memory_space<vmem>>, vector<1x32xf32>
    %c0_52 = arith.constant 0 : index
    %c0_53 = arith.constant 0 : index
    %119 = vector.load %arg10[%c0_52, %c0_53] : memref<1x32xf32, #tpu.memory_space<vmem>>, vector<1x32xf32>
    %cst_54 = arith.constant dense<0.000000e+00> : vector<16xf32>
    %120 = vector.multi_reduction <add>, %117, %cst_54 [1] : vector<16x32xf32> to vector<16xf32>
    %121 = vector.shape_cast %120 : vector<16xf32> to vector<16x1xf32>
    %cst_55 = arith.constant 3.200000e+01 : f32
    %122 = vector.broadcast %cst_55 : f32 to vector<16x1xf32>
    %123 = arith.divf %121, %122 : vector<16x1xf32>
    %124 = vector.broadcast %123 : vector<16x1xf32> to vector<16x32xf32>
    %125 = arith.subf %117, %124 : vector<16x32xf32>
    %126 = arith.mulf %125, %125 : vector<16x32xf32>
    %cst_56 = arith.constant dense<0.000000e+00> : vector<16xf32>
    %127 = vector.multi_reduction <add>, %126, %cst_56 [1] : vector<16x32xf32> to vector<16xf32>
    %128 = vector.shape_cast %127 : vector<16xf32> to vector<16x1xf32>
    %cst_57 = arith.constant 3.200000e+01 : f32
    %129 = vector.broadcast %cst_57 : f32 to vector<16x1xf32>
    %130 = arith.divf %128, %129 : vector<16x1xf32>
    %131 = vector.broadcast %123 : vector<16x1xf32> to vector<16x32xf32>
    %132 = arith.subf %117, %131 : vector<16x32xf32>
    %cst_58 = arith.constant 9.99999974E-6 : f32
    %133 = vector.broadcast %cst_58 : f32 to vector<16x1xf32>
    %134 = arith.addf %130, %133 : vector<16x1xf32>
    %135 = math.rsqrt %134 : vector<16x1xf32>
    %136 = vector.broadcast %135 : vector<16x1xf32> to vector<16x32xf32>
    %137 = arith.mulf %132, %136 : vector<16x32xf32>
    %138 = vector.broadcast %118 : vector<1x32xf32> to vector<16x32xf32>
    %139 = arith.mulf %137, %138 : vector<16x32xf32>
    %140 = vector.broadcast %119 : vector<1x32xf32> to vector<16x32xf32>
    %141 = arith.addf %139, %140 : vector<16x32xf32>
    %142 = arith.truncf %141 : vector<16x32xf32> to vector<16x32xbf16>
    %c0_59 = arith.constant 0 : index
    %c0_60 = arith.constant 0 : index
    %143 = vector.load %arg11[%c0_59, %c0_60] : memref<32x64xbf16, #tpu.memory_space<vmem>>, vector<32x64xbf16>
    %cst_61 = arith.constant dense<0.000000e+00> : vector<16x64xf32>
    %144 = tpu.matmul %142, %143, %cst_61 {dimension_numbers = #tpu.dot_dimension_numbers<[1], [0], [0], [1], [0, 0, 1, 1], [], []>} : vector<16x32xbf16>, vector<32x64xbf16>, vector<16x64xf32> -> vector<16x64xf32>
    %c0_62 = arith.constant 0 : index
    %c0_63 = arith.constant 0 : index
    %145 = vector.load %arg12[%c0_62, %c0_63] : memref<1x64xf32, #tpu.memory_space<vmem>>, vector<1x64xf32>
    %146 = vector.broadcast %145 : vector<1x64xf32> to vector<16x64xf32>
    %147 = arith.addf %144, %146 : vector<16x64xf32>
    %148 = arith.mulf %147, %147 : vector<16x64xf32>
    %149 = arith.mulf %147, %148 : vector<16x64xf32>
    %cst_64 = arith.constant 4.471500e-02 : f32
    %150 = vector.broadcast %cst_64 : f32 to vector<16x64xf32>
    %151 = arith.mulf %150, %149 : vector<16x64xf32>
    %152 = arith.addf %147, %151 : vector<16x64xf32>
    %cst_65 = arith.constant 0.797884583 : f32
    %153 = vector.broadcast %cst_65 : f32 to vector<16x64xf32>
    %154 = arith.mulf %153, %152 : vector<16x64xf32>
    %155 = math.tanh %154 : vector<16x64xf32>
    %cst_66 = arith.constant 1.000000e+00 : f32
    %156 = vector.broadcast %cst_66 : f32 to vector<16x64xf32>
    %157 = arith.addf %156, %155 : vector<16x64xf32>
    %cst_67 = arith.constant 5.000000e-01 : f32
    %158 = vector.broadcast %cst_67 : f32 to vector<16x64xf32>
    %159 = arith.mulf %158, %157 : vector<16x64xf32>
    %160 = arith.mulf %147, %159 : vector<16x64xf32>
    %161 = arith.truncf %160 : vector<16x64xf32> to vector<16x64xbf16>
    %c0_68 = arith.constant 0 : index
    %c0_69 = arith.constant 0 : index
    %162 = vector.load %arg13[%c0_68, %c0_69] : memref<64x32xbf16, #tpu.memory_space<vmem>>, vector<64x32xbf16>
    %cst_70 = arith.constant dense<0.000000e+00> : vector<16x32xf32>
    %163 = tpu.matmul %161, %162, %cst_70 {dimension_numbers = #tpu.dot_dimension_numbers<[1], [0], [0], [1], [0, 0, 1, 1], [], []>} : vector<16x64xbf16>, vector<64x32xbf16>, vector<16x32xf32> -> vector<16x32xf32>
    %164 = arith.addf %117, %163 : vector<16x32xf32>
    %c0_71 = arith.constant 0 : index
    %c0_72 = arith.constant 0 : index
    %165 = vector.load %arg14[%c0_71, %c0_72] : memref<1x32xf32, #tpu.memory_space<vmem>>, vector<1x32xf32>
    %166 = vector.broadcast %165 : vector<1x32xf32> to vector<16x32xf32>
    %167 = arith.addf %164, %166 : vector<16x32xf32>
    %c0_73 = arith.constant 0 : index
    %c0_74 = arith.constant 0 : index
    %168 = vector.load %arg15[%c0_73, %c0_74] : memref<1x32xf32, #tpu.memory_space<vmem>>, vector<1x32xf32>
    %c0_75 = arith.constant 0 : index
    %c0_76 = arith.constant 0 : index
    %169 = vector.load %arg16[%c0_75, %c0_76] : memref<1x32xf32, #tpu.memory_space<vmem>>, vector<1x32xf32>
    %cst_77 = arith.constant dense<0.000000e+00> : vector<16xf32>
    %170 = vector.multi_reduction <add>, %167, %cst_77 [1] : vector<16x32xf32> to vector<16xf32>
    %171 = vector.shape_cast %170 : vector<16xf32> to vector<16x1xf32>
    %cst_78 = arith.constant 3.200000e+01 : f32
    %172 = vector.broadcast %cst_78 : f32 to vector<16x1xf32>
    %173 = arith.divf %171, %172 : vector<16x1xf32>
    %174 = vector.broadcast %173 : vector<16x1xf32> to vector<16x32xf32>
    %175 = arith.subf %167, %174 : vector<16x32xf32>
    %176 = arith.mulf %175, %175 : vector<16x32xf32>
    %cst_79 = arith.constant dense<0.000000e+00> : vector<16xf32>
    %177 = vector.multi_reduction <add>, %176, %cst_79 [1] : vector<16x32xf32> to vector<16xf32>
    %178 = vector.shape_cast %177 : vector<16xf32> to vector<16x1xf32>
    %cst_80 = arith.constant 3.200000e+01 : f32
    %179 = vector.broadcast %cst_80 : f32 to vector<16x1xf32>
    %180 = arith.divf %178, %179 : vector<16x1xf32>
    %181 = vector.broadcast %173 : vector<16x1xf32> to vector<16x32xf32>
    %182 = arith.subf %167, %181 : vector<16x32xf32>
    %cst_81 = arith.constant 9.99999974E-6 : f32
    %183 = vector.broadcast %cst_81 : f32 to vector<16x1xf32>
    %184 = arith.addf %180, %183 : vector<16x1xf32>
    %185 = math.rsqrt %184 : vector<16x1xf32>
    %186 = vector.broadcast %185 : vector<16x1xf32> to vector<16x32xf32>
    %187 = arith.mulf %182, %186 : vector<16x32xf32>
    %188 = vector.broadcast %168 : vector<1x32xf32> to vector<16x32xf32>
    %189 = arith.mulf %187, %188 : vector<16x32xf32>
    %190 = vector.broadcast %169 : vector<1x32xf32> to vector<16x32xf32>
    %191 = arith.addf %189, %190 : vector<16x32xf32>
    %192 = arith.truncf %191 : vector<16x32xf32> to vector<16x32xbf16>
    %c0_82 = arith.constant 0 : index
    %c0_83 = arith.constant 0 : index
    %193 = vector.load %arg17[%c0_82, %c0_83] : memref<32x32xbf16, #tpu.memory_space<vmem>>, vector<32x32xbf16>
    %cst_84 = arith.constant dense<0.000000e+00> : vector<16x32xf32>
    %194 = tpu.matmul %192, %193, %cst_84 {dimension_numbers = #tpu.dot_dimension_numbers<[1], [0], [0], [1], [0, 0, 1, 1], [], []>} : vector<16x32xbf16>, vector<32x32xbf16>, vector<16x32xf32> -> vector<16x32xf32>
    %c0_85 = arith.constant 0 : index
    %c0_86 = arith.constant 0 : index
    %195 = vector.load %arg18[%c0_85, %c0_86] : memref<32x32xbf16, #tpu.memory_space<vmem>>, vector<32x32xbf16>
    %cst_87 = arith.constant dense<0.000000e+00> : vector<16x32xf32>
    %196 = tpu.matmul %192, %195, %cst_87 {dimension_numbers = #tpu.dot_dimension_numbers<[1], [0], [0], [1], [0, 0, 1, 1], [], []>} : vector<16x32xbf16>, vector<32x32xbf16>, vector<16x32xf32> -> vector<16x32xf32>
    %c0_88 = arith.constant 0 : index
    %c0_89 = arith.constant 0 : index
    %197 = vector.load %arg19[%c0_88, %c0_89] : memref<32x32xbf16, #tpu.memory_space<vmem>>, vector<32x32xbf16>
    %cst_90 = arith.constant dense<0.000000e+00> : vector<16x32xf32>
    %198 = tpu.matmul %192, %197, %cst_90 {dimension_numbers = #tpu.dot_dimension_numbers<[1], [0], [0], [1], [0, 0, 1, 1], [], []>} : vector<16x32xbf16>, vector<32x32xbf16>, vector<16x32xf32> -> vector<16x32xf32>
    %199 = vector.extract_strided_slice %194 {offsets = [0, 0], sizes = [16, 8], strides = [1, 1]} : vector<16x32xf32> to vector<16x8xf32>
    %200 = vector.extract_strided_slice %196 {offsets = [0, 0], sizes = [16, 8], strides = [1, 1]} : vector<16x32xf32> to vector<16x8xf32>
    %201 = vector.extract_strided_slice %198 {offsets = [0, 0], sizes = [16, 8], strides = [1, 1]} : vector<16x32xf32> to vector<16x8xf32>
    %202 = tpu.transpose %200, [1, 0] : vector<16x8xf32> -> vector<8x16xf32>
    %cst_91 = arith.constant dense<0.000000e+00> : vector<16x16xf32>
    %203 = tpu.matmul %199, %202, %cst_91 {dimension_numbers = #tpu.dot_dimension_numbers<[1], [0], [0], [1], [0, 0, 1, 1], [], []>} : vector<16x8xf32>, vector<8x16xf32>, vector<16x16xf32> -> vector<16x16xf32>
    %cst_92 = arith.constant 0.353553385 : f32
    %204 = vector.broadcast %cst_92 : f32 to vector<16x16xf32>
    %205 = arith.mulf %203, %204 : vector<16x16xf32>
    %206 = arith.addf %205, %1 : vector<16x16xf32>
    %cst_93 = arith.constant dense<0xFF800000> : vector<16xf32>
    %207 = vector.multi_reduction <maximumf>, %206, %cst_93 [1] : vector<16x16xf32> to vector<16xf32>
    %208 = vector.shape_cast %207 : vector<16xf32> to vector<16x1xf32>
    %209 = vector.broadcast %208 : vector<16x1xf32> to vector<16x16xf32>
    %210 = arith.subf %206, %209 : vector<16x16xf32>
    %211 = math.exp %210 : vector<16x16xf32>
    %cst_94 = arith.constant dense<0.000000e+00> : vector<16xf32>
    %212 = vector.multi_reduction <add>, %211, %cst_94 [1] : vector<16x16xf32> to vector<16xf32>
    %213 = vector.shape_cast %212 : vector<16xf32> to vector<16x1xf32>
    %214 = tpu.reciprocal %213 {approx = true} : vector<16x1xf32> -> vector<16x1xf32>
    %215 = vector.broadcast %214 : vector<16x1xf32> to vector<16x16xf32>
    %216 = arith.mulf %211, %215 : vector<16x16xf32>
    %cst_95 = arith.constant dense<0.000000e+00> : vector<16x8xf32>
    %217 = tpu.matmul %216, %201, %cst_95 {dimension_numbers = #tpu.dot_dimension_numbers<[1], [0], [0], [1], [0, 0, 1, 1], [], []>} : vector<16x16xf32>, vector<16x8xf32>, vector<16x8xf32> -> vector<16x8xf32>
    %c0_96 = arith.constant 0 : index
    %c0_97 = arith.constant 0 : index
    %218 = vector.load %arg32[%c0_96, %c0_97] : memref<16x32xf32, #tpu.memory_space<vmem>>, vector<16x8xf32>
    tpu.vector_store %arg32[%c0_96, %c0_97], %217 {strides = array<i32>} : memref<16x32xf32, #tpu.memory_space<vmem>>, vector<16x8xf32>,
    %219 = vector.extract_strided_slice %194 {offsets = [0, 8], sizes = [16, 8], strides = [1, 1]} : vector<16x32xf32> to vector<16x8xf32>
    %220 = vector.extract_strided_slice %196 {offsets = [0, 8], sizes = [16, 8], strides = [1, 1]} : vector<16x32xf32> to vector<16x8xf32>
    %221 = vector.extract_strided_slice %198 {offsets = [0, 8], sizes = [16, 8], strides = [1, 1]} : vector<16x32xf32> to vector<16x8xf32>
    %222 = tpu.transpose %220, [1, 0] : vector<16x8xf32> -> vector<8x16xf32>
    %cst_98 = arith.constant dense<0.000000e+00> : vector<16x16xf32>
    %223 = tpu.matmul %219, %222, %cst_98 {dimension_numbers = #tpu.dot_dimension_numbers<[1], [0], [0], [1], [0, 0, 1, 1], [], []>} : vector<16x8xf32>, vector<8x16xf32>, vector<16x16xf32> -> vector<16x16xf32>
    %cst_99 = arith.constant 0.353553385 : f32
    %224 = vector.broadcast %cst_99 : f32 to vector<16x16xf32>
    %225 = arith.mulf %223, %224 : vector<16x16xf32>
    %226 = arith.addf %225, %1 : vector<16x16xf32>
    %cst_100 = arith.constant dense<0xFF800000> : vector<16xf32>
    %227 = vector.multi_reduction <maximumf>, %226, %cst_100 [1] : vector<16x16xf32> to vector<16xf32>
    %228 = vector.shape_cast %227 : vector<16xf32> to vector<16x1xf32>
    %229 = vector.broadcast %228 : vector<16x1xf32> to vector<16x16xf32>
    %230 = arith.subf %226, %229 : vector<16x16xf32>
    %231 = math.exp %230 : vector<16x16xf32>
    %cst_101 = arith.constant dense<0.000000e+00> : vector<16xf32>
    %232 = vector.multi_reduction <add>, %231, %cst_101 [1] : vector<16x16xf32> to vector<16xf32>
    %233 = vector.shape_cast %232 : vector<16xf32> to vector<16x1xf32>
    %234 = tpu.reciprocal %233 {approx = true} : vector<16x1xf32> -> vector<16x1xf32>
    %235 = vector.broadcast %234 : vector<16x1xf32> to vector<16x16xf32>
    %236 = arith.mulf %231, %235 : vector<16x16xf32>
    %cst_102 = arith.constant dense<0.000000e+00> : vector<16x8xf32>
    %237 = tpu.matmul %236, %221, %cst_102 {dimension_numbers = #tpu.dot_dimension_numbers<[1], [0], [0], [1], [0, 0, 1, 1], [], []>} : vector<16x16xf32>, vector<16x8xf32>, vector<16x8xf32> -> vector<16x8xf32>
    %c0_103 = arith.constant 0 : index
    %c8_104 = arith.constant 8 : index
    %238 = vector.load %arg32[%c0_103, %c8_104] : memref<16x32xf32, #tpu.memory_space<vmem>>, vector<16x8xf32>
    tpu.vector_store %arg32[%c0_103, %c8_104], %237 {strides = array<i32>} : memref<16x32xf32, #tpu.memory_space<vmem>>, vector<16x8xf32>,
    %239 = vector.extract_strided_slice %194 {offsets = [0, 16], sizes = [16, 8], strides = [1, 1]} : vector<16x32xf32> to vector<16x8xf32>
    %240 = vector.extract_strided_slice %196 {offsets = [0, 16], sizes = [16, 8], strides = [1, 1]} : vector<16x32xf32> to vector<16x8xf32>
    %241 = vector.extract_strided_slice %198 {offsets = [0, 16], sizes = [16, 8], strides = [1, 1]} : vector<16x32xf32> to vector<16x8xf32>
    %242 = tpu.transpose %240, [1, 0] : vector<16x8xf32> -> vector<8x16xf32>
    %cst_105 = arith.constant dense<0.000000e+00> : vector<16x16xf32>
    %243 = tpu.matmul %239, %242, %cst_105 {dimension_numbers = #tpu.dot_dimension_numbers<[1], [0], [0], [1], [0, 0, 1, 1], [], []>} : vector<16x8xf32>, vector<8x16xf32>, vector<16x16xf32> -> vector<16x16xf32>
    %cst_106 = arith.constant 0.353553385 : f32
    %244 = vector.broadcast %cst_106 : f32 to vector<16x16xf32>
    %245 = arith.mulf %243, %244 : vector<16x16xf32>
    %246 = arith.addf %245, %1 : vector<16x16xf32>
    %cst_107 = arith.constant dense<0xFF800000> : vector<16xf32>
    %247 = vector.multi_reduction <maximumf>, %246, %cst_107 [1] : vector<16x16xf32> to vector<16xf32>
    %248 = vector.shape_cast %247 : vector<16xf32> to vector<16x1xf32>
    %249 = vector.broadcast %248 : vector<16x1xf32> to vector<16x16xf32>
    %250 = arith.subf %246, %249 : vector<16x16xf32>
    %251 = math.exp %250 : vector<16x16xf32>
    %cst_108 = arith.constant dense<0.000000e+00> : vector<16xf32>
    %252 = vector.multi_reduction <add>, %251, %cst_108 [1] : vector<16x16xf32> to vector<16xf32>
    %253 = vector.shape_cast %252 : vector<16xf32> to vector<16x1xf32>
    %254 = tpu.reciprocal %253 {approx = true} : vector<16x1xf32> -> vector<16x1xf32>
    %255 = vector.broadcast %254 : vector<16x1xf32> to vector<16x16xf32>
    %256 = arith.mulf %251, %255 : vector<16x16xf32>
    %cst_109 = arith.constant dense<0.000000e+00> : vector<16x8xf32>
    %257 = tpu.matmul %256, %241, %cst_109 {dimension_numbers = #tpu.dot_dimension_numbers<[1], [0], [0], [1], [0, 0, 1, 1], [], []>} : vector<16x16xf32>, vector<16x8xf32>, vector<16x8xf32> -> vector<16x8xf32>
    %c0_110 = arith.constant 0 : index
    %c16_111 = arith.constant 16 : index
    %258 = vector.load %arg32[%c0_110, %c16_111] : memref<16x32xf32, #tpu.memory_space<vmem>>, vector<16x8xf32>
    tpu.vector_store %arg32[%c0_110, %c16_111], %257 {strides = array<i32>} : memref<16x32xf32, #tpu.memory_space<vmem>>, vector<16x8xf32>,
    %259 = vector.extract_strided_slice %194 {offsets = [0, 24], sizes = [16, 8], strides = [1, 1]} : vector<16x32xf32> to vector<16x8xf32>
    %260 = vector.extract_strided_slice %196 {offsets = [0, 24], sizes = [16, 8], strides = [1, 1]} : vector<16x32xf32> to vector<16x8xf32>
    %261 = vector.extract_strided_slice %198 {offsets = [0, 24], sizes = [16, 8], strides = [1, 1]} : vector<16x32xf32> to vector<16x8xf32>
    %262 = tpu.transpose %260, [1, 0] : vector<16x8xf32> -> vector<8x16xf32>
    %cst_112 = arith.constant dense<0.000000e+00> : vector<16x16xf32>
    %263 = tpu.matmul %259, %262, %cst_112 {dimension_numbers = #tpu.dot_dimension_numbers<[1], [0], [0], [1], [0, 0, 1, 1], [], []>} : vector<16x8xf32>, vector<8x16xf32>, vector<16x16xf32> -> vector<16x16xf32>
    %cst_113 = arith.constant 0.353553385 : f32
    %264 = vector.broadcast %cst_113 : f32 to vector<16x16xf32>
    %265 = arith.mulf %263, %264 : vector<16x16xf32>
    %266 = arith.addf %265, %1 : vector<16x16xf32>
    %cst_114 = arith.constant dense<0xFF800000> : vector<16xf32>
    %267 = vector.multi_reduction <maximumf>, %266, %cst_114 [1] : vector<16x16xf32> to vector<16xf32>
    %268 = vector.shape_cast %267 : vector<16xf32> to vector<16x1xf32>
    %269 = vector.broadcast %268 : vector<16x1xf32> to vector<16x16xf32>
    %270 = arith.subf %266, %269 : vector<16x16xf32>
    %271 = math.exp %270 : vector<16x16xf32>
    %cst_115 = arith.constant dense<0.000000e+00> : vector<16xf32>
    %272 = vector.multi_reduction <add>, %271, %cst_115 [1] : vector<16x16xf32> to vector<16xf32>
    %273 = vector.shape_cast %272 : vector<16xf32> to vector<16x1xf32>
    %274 = tpu.reciprocal %273 {approx = true} : vector<16x1xf32> -> vector<16x1xf32>
    %275 = vector.broadcast %274 : vector<16x1xf32> to vector<16x16xf32>
    %276 = arith.mulf %271, %275 : vector<16x16xf32>
    %cst_116 = arith.constant dense<0.000000e+00> : vector<16x8xf32>
    %277 = tpu.matmul %276, %261, %cst_116 {dimension_numbers = #tpu.dot_dimension_numbers<[1], [0], [0], [1], [0, 0, 1, 1], [], []>} : vector<16x16xf32>, vector<16x8xf32>, vector<16x8xf32> -> vector<16x8xf32>
    %c0_117 = arith.constant 0 : index
    %c24_118 = arith.constant 24 : index
    %278 = vector.load %arg32[%c0_117, %c24_118] : memref<16x32xf32, #tpu.memory_space<vmem>>, vector<16x8xf32>
    tpu.vector_store %arg32[%c0_117, %c24_118], %277 {strides = array<i32>} : memref<16x32xf32, #tpu.memory_space<vmem>>, vector<16x8xf32>,
    %c0_119 = arith.constant 0 : index
    %c0_120 = arith.constant 0 : index
    %279 = vector.load %arg32[%c0_119, %c0_120] : memref<16x32xf32, #tpu.memory_space<vmem>>, vector<16x32xf32>
    %280 = arith.truncf %279 : vector<16x32xf32> to vector<16x32xbf16>
    %c0_121 = arith.constant 0 : index
    %c0_122 = arith.constant 0 : index
    %281 = vector.load %arg20[%c0_121, %c0_122] : memref<32x32xbf16, #tpu.memory_space<vmem>>, vector<32x32xbf16>
    %cst_123 = arith.constant dense<0.000000e+00> : vector<16x32xf32>
    %282 = tpu.matmul %280, %281, %cst_123 {dimension_numbers = #tpu.dot_dimension_numbers<[1], [0], [0], [1], [0, 0, 1, 1], [], []>} : vector<16x32xbf16>, vector<32x32xbf16>, vector<16x32xf32> -> vector<16x32xf32>
    %283 = arith.addf %167, %282 : vector<16x32xf32>
    %c0_124 = arith.constant 0 : index
    %c0_125 = arith.constant 0 : index
    %284 = vector.load %arg21[%c0_124, %c0_125] : memref<1x32xf32, #tpu.memory_space<vmem>>, vector<1x32xf32>
    %c0_126 = arith.constant 0 : index
    %c0_127 = arith.constant 0 : index
    %285 = vector.load %arg22[%c0_126, %c0_127] : memref<1x32xf32, #tpu.memory_space<vmem>>, vector<1x32xf32>
    %cst_128 = arith.constant dense<0.000000e+00> : vector<16xf32>
    %286 = vector.multi_reduction <add>, %283, %cst_128 [1] : vector<16x32xf32> to vector<16xf32>
    %287 = vector.shape_cast %286 : vector<16xf32> to vector<16x1xf32>
    %cst_129 = arith.constant 3.200000e+01 : f32
    %288 = vector.broadcast %cst_129 : f32 to vector<16x1xf32>
    %289 = arith.divf %287, %288 : vector<16x1xf32>
    %290 = vector.broadcast %289 : vector<16x1xf32> to vector<16x32xf32>
    %291 = arith.subf %283, %290 : vector<16x32xf32>
    %292 = arith.mulf %291, %291 : vector<16x32xf32>
    %cst_130 = arith.constant dense<0.000000e+00> : vector<16xf32>
    %293 = vector.multi_reduction <add>, %292, %cst_130 [1] : vector<16x32xf32> to vector<16xf32>
    %294 = vector.shape_cast %293 : vector<16xf32> to vector<16x1xf32>
    %cst_131 = arith.constant 3.200000e+01 : f32
    %295 = vector.broadcast %cst_131 : f32 to vector<16x1xf32>
    %296 = arith.divf %294, %295 : vector<16x1xf32>
    %297 = vector.broadcast %289 : vector<16x1xf32> to vector<16x32xf32>
    %298 = arith.subf %283, %297 : vector<16x32xf32>
    %cst_132 = arith.constant 9.99999974E-6 : f32
    %299 = vector.broadcast %cst_132 : f32 to vector<16x1xf32>
    %300 = arith.addf %296, %299 : vector<16x1xf32>
    %301 = math.rsqrt %300 : vector<16x1xf32>
    %302 = vector.broadcast %301 : vector<16x1xf32> to vector<16x32xf32>
    %303 = arith.mulf %298, %302 : vector<16x32xf32>
    %304 = vector.broadcast %284 : vector<1x32xf32> to vector<16x32xf32>
    %305 = arith.mulf %303, %304 : vector<16x32xf32>
    %306 = vector.broadcast %285 : vector<1x32xf32> to vector<16x32xf32>
    %307 = arith.addf %305, %306 : vector<16x32xf32>
    %308 = arith.truncf %307 : vector<16x32xf32> to vector<16x32xbf16>
    %c0_133 = arith.constant 0 : index
    %c0_134 = arith.constant 0 : index
    %309 = vector.load %arg23[%c0_133, %c0_134] : memref<32x64xbf16, #tpu.memory_space<vmem>>, vector<32x64xbf16>
    %cst_135 = arith.constant dense<0.000000e+00> : vector<16x64xf32>
    %310 = tpu.matmul %308, %309, %cst_135 {dimension_numbers = #tpu.dot_dimension_numbers<[1], [0], [0], [1], [0, 0, 1, 1], [], []>} : vector<16x32xbf16>, vector<32x64xbf16>, vector<16x64xf32> -> vector<16x64xf32>
    %c0_136 = arith.constant 0 : index
    %c0_137 = arith.constant 0 : index
    %311 = vector.load %arg24[%c0_136, %c0_137] : memref<1x64xf32, #tpu.memory_space<vmem>>, vector<1x64xf32>
    %312 = vector.broadcast %311 : vector<1x64xf32> to vector<16x64xf32>
    %313 = arith.addf %310, %312 : vector<16x64xf32>
    %314 = arith.mulf %313, %313 : vector<16x64xf32>
    %315 = arith.mulf %313, %314 : vector<16x64xf32>
    %cst_138 = arith.constant 4.471500e-02 : f32
    %316 = vector.broadcast %cst_138 : f32 to vector<16x64xf32>
    %317 = arith.mulf %316, %315 : vector<16x64xf32>
    %318 = arith.addf %313, %317 : vector<16x64xf32>
    %cst_139 = arith.constant 0.797884583 : f32
    %319 = vector.broadcast %cst_139 : f32 to vector<16x64xf32>
    %320 = arith.mulf %319, %318 : vector<16x64xf32>
    %321 = math.tanh %320 : vector<16x64xf32>
    %cst_140 = arith.constant 1.000000e+00 : f32
    %322 = vector.broadcast %cst_140 : f32 to vector<16x64xf32>
    %323 = arith.addf %322, %321 : vector<16x64xf32>
    %cst_141 = arith.constant 5.000000e-01 : f32
    %324 = vector.broadcast %cst_141 : f32 to vector<16x64xf32>
    %325 = arith.mulf %324, %323 : vector<16x64xf32>
    %326 = arith.mulf %313, %325 : vector<16x64xf32>
    %327 = arith.truncf %326 : vector<16x64xf32> to vector<16x64xbf16>
    %c0_142 = arith.constant 0 : index
    %c0_143 = arith.constant 0 : index
    %328 = vector.load %arg25[%c0_142, %c0_143] : memref<64x32xbf16, #tpu.memory_space<vmem>>, vector<64x32xbf16>
    %cst_144 = arith.constant dense<0.000000e+00> : vector<16x32xf32>
    %329 = tpu.matmul %327, %328, %cst_144 {dimension_numbers = #tpu.dot_dimension_numbers<[1], [0], [0], [1], [0, 0, 1, 1], [], []>} : vector<16x64xbf16>, vector<64x32xbf16>, vector<16x32xf32> -> vector<16x32xf32>
    %330 = arith.addf %283, %329 : vector<16x32xf32>
    %c0_145 = arith.constant 0 : index
    %c0_146 = arith.constant 0 : index
    %331 = vector.load %arg26[%c0_145, %c0_146] : memref<1x32xf32, #tpu.memory_space<vmem>>, vector<1x32xf32>
    %332 = vector.broadcast %331 : vector<1x32xf32> to vector<16x32xf32>
    %333 = arith.addf %330, %332 : vector<16x32xf32>
    %c0_147 = arith.constant 0 : index
    %c0_148 = arith.constant 0 : index
    %334 = vector.load %arg27[%c0_147, %c0_148] : memref<1x32xf32, #tpu.memory_space<vmem>>, vector<1x32xf32>
    %c0_149 = arith.constant 0 : index
    %c0_150 = arith.constant 0 : index
    %335 = vector.load %arg28[%c0_149, %c0_150] : memref<1x32xf32, #tpu.memory_space<vmem>>, vector<1x32xf32>
    %cst_151 = arith.constant dense<0.000000e+00> : vector<16xf32>
    %336 = vector.multi_reduction <add>, %333, %cst_151 [1] : vector<16x32xf32> to vector<16xf32>
    %337 = vector.shape_cast %336 : vector<16xf32> to vector<16x1xf32>
    %cst_152 = arith.constant 3.200000e+01 : f32
    %338 = vector.broadcast %cst_152 : f32 to vector<16x1xf32>
    %339 = arith.divf %337, %338 : vector<16x1xf32>
    %340 = vector.broadcast %339 : vector<16x1xf32> to vector<16x32xf32>
    %341 = arith.subf %333, %340 : vector<16x32xf32>
    %342 = arith.mulf %341, %341 : vector<16x32xf32>
    %cst_153 = arith.constant dense<0.000000e+00> : vector<16xf32>
    %343 = vector.multi_reduction <add>, %342, %cst_153 [1] : vector<16x32xf32> to vector<16xf32>
    %344 = vector.shape_cast %343 : vector<16xf32> to vector<16x1xf32>
    %cst_154 = arith.constant 3.200000e+01 : f32
    %345 = vector.broadcast %cst_154 : f32 to vector<16x1xf32>
    %346 = arith.divf %344, %345 : vector<16x1xf32>
    %347 = vector.broadcast %339 : vector<16x1xf32> to vector<16x32xf32>
    %348 = arith.subf %333, %347 : vector<16x32xf32>
    %cst_155 = arith.constant 9.99999974E-6 : f32
    %349 = vector.broadcast %cst_155 : f32 to vector<16x1xf32>
    %350 = arith.addf %346, %349 : vector<16x1xf32>
    %351 = math.rsqrt %350 : vector<16x1xf32>
    %352 = vector.broadcast %351 : vector<16x1xf32> to vector<16x32xf32>
    %353 = arith.mulf %348, %352 : vector<16x32xf32>
    %354 = vector.broadcast %334 : vector<1x32xf32> to vector<16x32xf32>
    %355 = arith.mulf %353, %354 : vector<16x32xf32>
    %356 = vector.broadcast %335 : vector<1x32xf32> to vector<16x32xf32>
    %357 = arith.addf %355, %356 : vector<16x32xf32>
    %358 = arith.truncf %357 : vector<16x32xf32> to vector<16x32xbf16>
    %c0_156 = arith.constant 0 : index
    %c0_157 = arith.constant 0 : index
    %359 = vector.load %arg29[%c0_156, %c0_157] : memref<32x128xbf16, #tpu.memory_space<vmem>>, vector<32x128xbf16>
    %cst_158 = arith.constant dense<0.000000e+00> : vector<16x128xf32>
    %360 = tpu.matmul %358, %359, %cst_158 {dimension_numbers = #tpu.dot_dimension_numbers<[1], [0], [0], [1], [0, 0, 1, 1], [], []>} : vector<16x32xbf16>, vector<32x128xbf16>, vector<16x128xf32> -> vector<16x128xf32>
    %c0_159 = arith.constant 0 : index
    %c0_160 = arith.constant 0 : index
    %361 = vector.load %arg30[%c0_159, %c0_160] : memref<1x128xf32, #tpu.memory_space<vmem>>, vector<1x128xf32>
    %362 = vector.broadcast %361 : vector<1x128xf32> to vector<16x128xf32>
    %363 = arith.addf %360, %362 : vector<16x128xf32>
    %c0_161 = arith.constant 0 : index
    %c0_162 = arith.constant 0 : index
    %364 = vector.load %arg31[%c0_161, %c0_162] : memref<16x128xf32, #tpu.memory_space<vmem>>, vector<16x128xf32>
    tpu.vector_store %arg31[%c0_161, %c0_162], %363 {strides = array<i32>} : memref<16x128xf32, #tpu.memory_space<vmem>>, vector<16x128xf32>,
    return
  }
  func.func @transform_0(%arg0: i32) -> (i32, i32) {
    %c0_i32 = arith.constant 0 : i32
    %c0_i32_0 = arith.constant 0 : i32
    %c0_i32_1 = arith.constant 0 : i32
    return %c0_i32, %c0_i32_0 : i32, i32
  }
  func.func @transform_1(%arg0: i32) -> (i32, i32) {
    %c0_i32 = arith.constant 0 : i32
    %c0_i32_0 = arith.constant 0 : i32
    %c0_i32_1 = arith.constant 0 : i32
    return %c0_i32, %c0_i32_0 : i32, i32
  }
  func.func @transform_2(%arg0: i32) -> (i32, i32) {
    %c0_i32 = arith.constant 0 : i32
    %c0_i32_0 = arith.constant 0 : i32
    %c0_i32_1 = arith.constant 0 : i32
    return %c0_i32, %c0_i32_0 : i32, i32
  }
  func.func @transform_3(%arg0: i32) -> (i32, i32) {
    %c0_i32 = arith.constant 0 : i32
    %c0_i32_0 = arith.constant 0 : i32
    %c0_i32_1 = arith.constant 0 : i32
    return %c0_i32, %c0_i32_0 : i32, i32
  }
  func.func @transform_4(%arg0: i32) -> (i32, i32) {
    %c0_i32 = arith.constant 0 : i32
    %c0_i32_0 = arith.constant 0 : i32
    %c0_i32_1 = arith.constant 0 : i32
    return %c0_i32, %c0_i32_0 : i32, i32
  }
  func.func @transform_5(%arg0: i32) -> (i32, i32) {
    %c0_i32 = arith.constant 0 : i32
    %c0_i32_0 = arith.constant 0 : i32
    %c0_i32_1 = arith.constant 0 : i32
    return %c0_i32, %c0_i32_0 : i32, i32
  }
  func.func @transform_6(%arg0: i32) -> (i32, i32) {
    %c0_i32 = arith.constant 0 : i32
    %c0_i32_0 = arith.constant 0 : i32
    %c0_i32_1 = arith.constant 0 : i32
    return %c0_i32, %c0_i32_0 : i32, i32
  }
  func.func @transform_7(%arg0: i32) -> (i32, i32) {
    %c0_i32 = arith.constant 0 : i32
    %c0_i32_0 = arith.constant 0 : i32
    %c0_i32_1 = arith.constant 0 : i32
    return %c0_i32, %c0_i32_0 : i32, i32
  }
  func.func @transform_8(%arg0: i32) -> (i32, i32) {
    %c0_i32 = arith.constant 0 : i32
    %c0_i32_0 = arith.constant 0 : i32
    %c0_i32_1 = arith.constant 0 : i32
    return %c0_i32, %c0_i32_0 : i32, i32
  }
  func.func @transform_9(%arg0: i32) -> (i32, i32) {
    %c0_i32 = arith.constant 0 : i32
    %c0_i32_0 = arith.constant 0 : i32
    %c0_i32_1 = arith.constant 0 : i32
    return %c0_i32, %c0_i32_0 : i32, i32
  }
  func.func @transform_10(%arg0: i32) -> (i32, i32) {
    %c0_i32 = arith.constant 0 : i32
    %c0_i32_0 = arith.constant 0 : i32
    %c0_i32_1 = arith.constant 0 : i32
    return %c0_i32, %c0_i32_0 : i32, i32
  }
  func.func @transform_11(%arg0: i32) -> (i32, i32) {
    %c0_i32 = arith.constant 0 : i32
    %c0_i32_0 = arith.constant 0 : i32
    %c0_i32_1 = arith.constant 0 : i32
    return %c0_i32, %c0_i32_0 : i32, i32
  }
  func.func @transform_12(%arg0: i32) -> (i32, i32) {
    %c0_i32 = arith.constant 0 : i32
    %c0_i32_0 = arith.constant 0 : i32
    %c0_i32_1 = arith.constant 0 : i32
    return %c0_i32, %c0_i32_0 : i32, i32
  }
  func.func @transform_13(%arg0: i32) -> (i32, i32) {
    %c0_i32 = arith.constant 0 : i32
    %c0_i32_0 = arith.constant 0 : i32
    %c0_i32_1 = arith.constant 0 : i32
    return %c0_i32, %c0_i32_0 : i32, i32
  }
  func.func @transform_14(%arg0: i32) -> (i32, i32) {
    %c0_i32 = arith.constant 0 : i32
    %c0_i32_0 = arith.constant 0 : i32
    %c0_i32_1 = arith.constant 0 : i32
    return %c0_i32, %c0_i32_0 : i32, i32
  }
  func.func @transform_15(%arg0: i32) -> (i32, i32) {
    %c0_i32 = arith.constant 0 : i32
    %c0_i32_0 = arith.constant 0 : i32
    %c0_i32_1 = arith.constant 0 : i32
    return %c0_i32, %c0_i32_0 : i32, i32
  }
  func.func @transform_16(%arg0: i32) -> (i32, i32) {
    %c0_i32 = arith.constant 0 : i32
    %c0_i32_0 = arith.constant 0 : i32
    %c0_i32_1 = arith.constant 0 : i32
    return %c0_i32, %c0_i32_0 : i32, i32
  }
  func.func @transform_17(%arg0: i32) -> (i32, i32) {
    %c0_i32 = arith.constant 0 : i32
    %c0_i32_0 = arith.constant 0 : i32
    %c0_i32_1 = arith.constant 0 : i32
    return %c0_i32, %c0_i32_0 : i32, i32
  }
  func.func @transform_18(%arg0: i32) -> (i32, i32) {
    %c0_i32 = arith.constant 0 : i32
    %c0_i32_0 = arith.constant 0 : i32
    %c0_i32_1 = arith.constant 0 : i32
    return %c0_i32, %c0_i32_0 : i32, i32
  }
  func.func @transform_19(%arg0: i32) -> (i32, i32) {
    %c0_i32 = arith.constant 0 : i32
    %c0_i32_0 = arith.constant 0 : i32
    %c0_i32_1 = arith.constant 0 : i32
    return %c0_i32, %c0_i32_0 : i32, i32
  }
  func.func @transform_20(%arg0: i32) -> (i32, i32) {
    %c0_i32 = arith.constant 0 : i32
    %c0_i32_0 = arith.constant 0 : i32
    %c0_i32_1 = arith.constant 0 : i32
    return %c0_i32, %c0_i32_0 : i32, i32
  }
  func.func @transform_21(%arg0: i32) -> (i32, i32) {
    %c0_i32 = arith.constant 0 : i32
    %c0_i32_0 = arith.constant 0 : i32
    %c0_i32_1 = arith.constant 0 : i32
    return %c0_i32, %c0_i32_0 : i32, i32
  }
  func.func @transform_22(%arg0: i32) -> (i32, i32) {
    %c0_i32 = arith.constant 0 : i32
    %c0_i32_0 = arith.constant 0 : i32
    %c0_i32_1 = arith.constant 0 : i32
    return %c0_i32, %c0_i32_0 : i32, i32
  }
  func.func @transform_23(%arg0: i32) -> (i32, i32) {
    %c0_i32 = arith.constant 0 : i32
    %c0_i32_0 = arith.constant 0 : i32
    %c0_i32_1 = arith.constant 0 : i32
    return %c0_i32, %c0_i32_0 : i32, i32
  }
  func.func @transform_24(%arg0: i32) -> (i32, i32) {
    %c0_i32 = arith.constant 0 : i32
    %c0_i32_0 = arith.constant 0 : i32
    %c0_i32_1 = arith.constant 0 : i32
    return %c0_i32, %c0_i32_0 : i32, i32
  }
  func.func @transform_25(%arg0: i32) -> (i32, i32) {
    %c0_i32 = arith.constant 0 : i32
    %c0_i32_0 = arith.constant 0 : i32
    %c0_i32_1 = arith.constant 0 : i32
    return %c0_i32, %c0_i32_0 : i32, i32
  }
  func.func @transform_26(%arg0: i32) -> (i32, i32) {
    %c0_i32 = arith.constant 0 : i32
    %c0_i32_0 = arith.constant 0 : i32
    %c0_i32_1 = arith.constant 0 : i32
    return %c0_i32, %c0_i32_0 : i32, i32
  }
  func.func @transform_27(%arg0: i32) -> (i32, i32) {
    %c0_i32 = arith.constant 0 : i32
    %c0_i32_0 = arith.constant 0 : i32
    %c0_i32_1 = arith.constant 0 : i32
    return %c0_i32, %c0_i32_0 : i32, i32
  }
  func.func @transform_28(%arg0: i32) -> (i32, i32) {
    %c0_i32 = arith.constant 0 : i32
    %c0_i32_0 = arith.constant 0 : i32
    %c0_i32_1 = arith.constant 0 : i32
    return %c0_i32, %c0_i32_0 : i32, i32
  }
  func.func @transform_29(%arg0: i32) -> (i32, i32) {
    %c0_i32 = arith.constant 0 : i32
    %c0_i32_0 = arith.constant 0 : i32
    %c0_i32_1 = arith.constant 0 : i32
    return %c0_i32, %c0_i32_0 : i32, i32
  }
  func.func @transform_30(%arg0: i32) -> (i32, i32) {
    %c0_i32 = arith.constant 0 : i32
    %c0_i32_0 = arith.constant 0 : i32
    %c0_i32_1 = arith.constant 0 : i32
    return %c0_i32, %c0_i32_0 : i32, i32
  }
}

</mosaic_0001>

<bundles_post_ra>
// kernel: tpu_custom_call.1
= control target key start
LH: loop header
LB: loop body
LE: loop exit
PB: predicated region body
PF: predicated region fallthrough
CT: control target
= control target key end

     0   :  { %s4269_s6 = smov 1   ;;  %s4270_s10 = smov 2   ;;  %s4942_s0 = inlined_call_operand.smem [shape: u32[31], index: -1, kind: input, shape index: {}] }
   0x1   :  { %s4338_s5 = sld [smem:[%s4942_s0]]   ;;  %s4271_s14 = smov 3  }
   0x2   :  { %s4343_s9 = sld [smem:[%s4942_s0 + %s4269_s6]]   ;;  %s4272_s18 = smov 4  }
   0x3   :  { %s4348_s13 = sld [smem:[%s4942_s0 + %s4270_s10]]   ;;  %s4273_s22 = smov 5  }
   0x4   :  { %s4353_s17 = sld [smem:[%s4942_s0 + %s4271_s14]]   ;;  %s4274_s26 = smov 6  }
   0x5   :  { %s4358_s21 = sld [smem:[%s4942_s0 + %s4272_s18]]   ;;  %s4275_s30 = smov 7  }
   0x6   :  { %s4363_s25 = sld [smem:[%s4942_s0 + %s4273_s22]]   ;;  %s4276_s4 = smov 8  }
   0x7   :  { %4951 = sst [smem:[#allocation45_spill]] %s4338_s5  ;;  %s4277_s10 = smov 9  }
   0x8   :  { %4952 = sst [smem:[#allocation46_spill]] %s4343_s9  ;;  %s4278_s15 = smov 10  }
   0x9   :  { %s4368_s29 = sld [smem:[%s4942_s0 + %s4274_s26]]   ;;  %s4279_s20 = smov 11  }
   0xa   :  { %s4373_s3 = sld [smem:[%s4942_s0 + %s4275_s30]]   ;;  %s4280_s26 = smov 12  }
   0xb   :  { %4953 = sst [smem:[#allocation47_spill]] %s4358_s21  ;;  %s4281_s1 = smov 13  }
   0xc   :  { %4954 = sst [smem:[#allocation48_spill]] %s4363_s25  ;;  %s4282_s7 = smov 14  }
   0xd   :  { %s4378_s8 = sld [smem:[%s4942_s0 + %s4276_s4]]   ;;  %s4284_s22 = smov 16  }
   0xe   :  { %s4383_s14 = sld [smem:[%s4942_s0 + %s4277_s10]]   ;;  %s4285_s28 = smov 17  }
   0xf   :  { %4955 = sst [smem:[#allocation49_spill]] %s4368_s29 }
  0x10   :  { %s4388_s19 = sld [smem:[%s4942_s0 + %s4278_s15]]   ;;  %s4283_s15 = smov 15  }
  0x11   :  { %s4393_s24 = sld [smem:[%s4942_s0 + %s4279_s20]]  }
  0x12   :  { %s4398_s30 = sld [smem:[%s4942_s0 + %s4280_s26]]  }
  0x13   :  { %s4403_s6 = sld [smem:[%s4942_s0 + %s4281_s1]]  }
  0x14   :  { %s4408_s12 = sld [smem:[%s4942_s0 + %s4282_s7]]   ;;  %s4286_s7 = smov 18  }
  0x15   :  { %s4413_s20 = sld [smem:[%s4942_s0 + %s4283_s15]]   ;;  %s4287_s15 = smov 19  }
  0x16   :  { %s4418_s27 = sld [smem:[%s4942_s0 + %s4284_s22]]   ;;  %s4288_s22 = smov 20  }
  0x17   :  { %s4423_s4 = sld [smem:[%s4942_s0 + %s4285_s28]]   ;;  %s4289_s28 = smov 21  }
  0x18   :  { %4956 = sst [smem:[#allocation50_spill]] %s4398_s30 }
  0x19   :  { %s4428_s30 = sld [smem:[%s4942_s0 + %s4286_s7]]   ;;  %s4290_s7 = smov 22  }
  0x1a   :  { %s4433_s9 = sld [smem:[%s4942_s0 + %s4287_s15]]   ;;  %s4291_s15 = smov 23  }
  0x1b   :  { %s4438_s29 = sld [smem:[%s4942_s0 + %s4288_s22]]   ;;  %s4292_s22 = smov 24  }
  0x1c   :  { %4957 = sst [smem:[#allocation51_spill]] %s4418_s27 }
  0x1d   :  { %s4443_s25 = sld [smem:[%s4942_s0 + %s4289_s28]]   ;;  %s4293_s28 = smov 25  }
  0x1e   :  { %s4453_s21 = sld [smem:[%s4942_s0 + %s4291_s15]]   ;;  %s4295_s15 = smov 27  }
  0x1f   :  { %4958 = sst [smem:[#allocation52_spill]] %s4428_s30 }
  0x20   :  { %4959 = sst [smem:[#allocation53_spill]] %s4433_s9 }
  0x21   :  { %4960 = sst [smem:[#allocation54_spill]] %s4438_s29 }
  0x22   :  { %s4448_s30 = sld [smem:[%s4942_s0 + %s4290_s7]]   ;;  %s4294_s7 = smov 26  }
  0x23   :  { %s4458_s29 = sld [smem:[%s4942_s0 + %s4292_s22]]   ;;  %s4296_s22 = smov 28  }
  0x24   :  { %s4463_s5 = sld [smem:[%s4942_s0 + %s4293_s28]]   ;;  %s4297_s28 = smov 29  }
  0x25   :  { %s4473_s9 = sld [smem:[%s4942_s0 + %s4295_s15]]  }
  0x28   :  { %4961 = sst [smem:[#allocation55_spill]] %s4448_s30 }
  0x29   :  { %4962 = sst [smem:[#allocation56_spill]] %s4458_s29 }
  0x2a   :  { %4963 = sst [smem:[#allocation57_spill]] %s4463_s5 }
  0x2b   :  { %s4468_s30 = sld [smem:[%s4942_s0 + %s4294_s7]]   ;;  %s4298_s7 = smov 30  }
  0x2c   :  { %s4478_s29 = sld [smem:[%s4942_s0 + %s4296_s22]]  }
  0x2d   :  { %s4483_s5 = sld [smem:[%s4942_s0 + %s4297_s28]]  }
  0x2e   :  { %s4488_s27 = sld [smem:[%s4942_s0 + %s4298_s7]]  }
  0x2f   :  { %66 = vsyncpa [#allocation4], 0 }
  0x30   :  { %67 = vsyncpa [#allocation7], 0 }
  0x31   :  { %68 = vsyncpa [#allocation10], 0 }
  0x32   :  { %69 = vsyncpa [#allocation13], 0 }
  0x33   :  { %70 = vsyncpa [#allocation16], 0 }
  0x34   :  { %71 = vsyncpa [#allocation19], 0 }
  0x35   :  { %72 = vsyncpa [#allocation22], 0 }
  0x36   :  { %73 = vsyncpa [#allocation25], 0 }
  0x37   :  { %74 = vsyncpa [#allocation28], 0 }
  0x38   :  { %75 = vsyncpa [#allocation31], 0 }
  0x39   :  { %76 = vsyncpa [#allocation5], 0  ;;  %s4299_s15 = smov [#allocation6]   ;;  %s4300_s18 = smov [#allocation9]  }
  0x3a   :  { %s97_s16 = sshll.u32 %s4299_s15, 4  ;;  %s125_s22 = sshll.u32 %s4300_s18, 4  ;;  %s98_s16 = int_to_ptr.vmem [resolvable:$true] %s97_s16  ;;  %s126_s22 = int_to_ptr.vmem [resolvable:$true] %s125_s22 }
  0x3b   :  { %s3855_s23 = scalar_lea.vmem %s98_s16, 16  ;;  %s3859_s0 = scalar_lea.vmem %s98_s16, 32 }
  0x3c   :  { %p3856_p0 = scmp.ne.s32.totalorder %s98_s16, %s3855_s23  ;;  %p3860_p1 = scmp.lt.s32.totalorder %s98_s16, %s98_s16 }
  0x3d   :  { %p3861_p2 = scmp.lt.s32.totalorder %s3859_s0, %s3855_s23 }
  0x3f   :  { %p3862_p3 = por %p3861_p2, %p3860_p1 }
  0x41   :  { %p3863_p4 = pnand %p3862_p3, %p3856_p0 }
  0x43   :  { %3866 = shalt.err (!%p3863_p4)
}
  0x44   :  { %100 = dma.hbm_to_vmem [thread:$0]  %s4353_s17, 16, %s98_s16, [#allocation7]  }
  0x45   :  { %s3875_s26 = scalar_lea.vmem %s126_s22, 16  ;;  %s3879_s28 = scalar_lea.vmem %s126_s22, 32 }
  0x46   :  { %p3876_p5 = scmp.ne.s32.totalorder %s126_s22, %s3875_s26  ;;  %p3880_p6 = scmp.lt.s32.totalorder %s126_s22, %s126_s22 }
  0x47   :  { %p3881_p7 = scmp.lt.s32.totalorder %s3879_s28, %s3875_s26 }
  0x49   :  { %p3882_p8 = por %p3881_p7, %p3880_p6 }
  0x4b   :  { %p3883_p9 = pnand %p3882_p8, %p3876_p5 }
  0x4d   :  { %3886 = shalt.err (!%p3883_p9)
}
  0x4e   :  { %128 = dma.hbm_to_vmem [thread:$0]  %s4378_s8, 16, %s126_s22, [#allocation10]  }
  0x4f   :  { %s4301_s1 = smov [#allocation12]   ;;  %s4302_s7 = smov [#allocation15]  }
  0x50   :  { %s144_s2 = sshll.u32 %s4301_s1, 4  ;;  %s169_s10 = sshll.u32 %s4302_s7, 4  ;;  %s145_s2 = int_to_ptr.vmem [resolvable:$true] %s144_s2  ;;  %s170_s10 = int_to_ptr.vmem [resolvable:$true] %s169_s10 }
  0x51   :  { %s3895_s11 = scalar_lea.vmem %s145_s2, 256  ;;  %p3900_p11 = scmp.lt.s32.totalorder %s145_s2, %s145_s2 }
  0x52   :  { %p3896_p10 = scmp.ne.s32.totalorder %s145_s2, %s3895_s11  ;;  %p3901_p12 = scmp.lt.s32.totalorder %s3895_s11, %s3895_s11 }
  0x54   :  { %p3902_p13 = por %p3901_p12, %p3900_p11 }
  0x56   :  { %p3903_p0 = pnand %p3902_p13, %p3896_p10 }
  0x58   :  { %3906 = shalt.err (!%p3903_p0)
}
  0x59   :  { %s4303_s17 = smov 64   ;;  %s4304_s15 = smov 4  }
  0x5a   :  { %150 = dma.hbm_to_vmem [thread:$0]  %s4388_s19, 256, %s145_s2, [#allocation13], %s4303_s17, %s4303_s17, %s4304_s15  }
  0x5b   :  { %s3915_s8 = scalar_lea.vmem %s170_s10, 16  ;;  %s3919_s16 = scalar_lea.vmem %s170_s10, 32 }
  0x5c   :  { %p3916_p1 = scmp.ne.s32.totalorder %s170_s10, %s3915_s8  ;;  %p3920_p2 = scmp.lt.s32.totalorder %s170_s10, %s170_s10 }
  0x5d   :  { %p3921_p3 = scmp.lt.s32.totalorder %s3919_s16, %s3915_s8 }
  0x5f   :  { %p3922_p4 = por %p3921_p3, %p3920_p2 }
  0x61   :  { %p3923_p5 = pnand %p3922_p4, %p3916_p1 }
  0x63   :  { %3926 = shalt.err (!%p3923_p5)
}
  0x64   :  { %172 = dma.hbm_to_vmem [thread:$0]  %s4403_s6, 16, %s170_s10, [#allocation16]  }
  0x65   :  { %s4305_s18 = smov [#allocation18]   ;;  %s4306_s23 = smov [#allocation21]  }
  0x66   :  { %s189_s22 = sshll.u32 %s4305_s18, 4  ;;  %s210_s0 = sshll.u32 %s4306_s23, 4  ;;  %s190_s22 = int_to_ptr.vmem [resolvable:$true] %s189_s22  ;;  %s211_s0 = int_to_ptr.vmem [resolvable:$true] %s210_s0 }
  0x67   :  { %s3935_s26 = scalar_lea.vmem %s190_s22, 16  ;;  %s3939_s28 = scalar_lea.vmem %s190_s22, 32 }
  0x68   :  { %p3936_p6 = scmp.ne.s32.totalorder %s190_s22, %s3935_s26  ;;  %p3940_p7 = scmp.lt.s32.totalorder %s190_s22, %s190_s22 }
  0x69   :  { %p3941_p8 = scmp.lt.s32.totalorder %s3939_s28, %s3935_s26 }
  0x6b   :  { %p3942_p9 = por %p3941_p8, %p3940_p7 }
  0x6d   :  { %p3943_p10 = pnand %p3942_p9, %p3936_p6 }
  0x6f   :  { %3946 = shalt.err (!%p3943_p10)
}
  0x70   :  { %192 = dma.hbm_to_vmem [thread:$0]  %s4413_s20, 16, %s190_s22, [#allocation19]  }
  0x71   :  { %s3955_s19 = scalar_lea.vmem %s211_s0, 256  ;;  %p3960_p12 = scmp.lt.s32.totalorder %s211_s0, %s211_s0 }
  0x72   :  { %p3956_p11 = scmp.ne.s32.totalorder %s211_s0, %s3955_s19  ;;  %p3961_p13 = scmp.lt.s32.totalorder %s3955_s19, %s3955_s19 }
  0x74   :  { %p3962_p0 = por %p3961_p13, %p3960_p12 }
  0x76   :  { %p3963_p1 = pnand %p3962_p0, %p3956_p11 }
  0x78   :  { %3966 = shalt.err (!%p3963_p1)
}
  0x79   :  { %216 = dma.hbm_to_vmem [thread:$0]  %s4423_s4, 256, %s211_s0, [#allocation22], %s4303_s17, %s4303_s17, %s4304_s15  }
  0x7a   :  { %s4307_s6 = smov [#allocation24]   ;;  %s4308_s2 = smov [#allocation27]  }
  0x7b   :  { %s239_s1 = sshll.u32 %s4307_s6, 4  ;;  %s261_s7 = sshll.u32 %s4308_s2, 4  ;;  %s240_s1 = int_to_ptr.vmem [resolvable:$true] %s239_s1  ;;  %s262_s7 = int_to_ptr.vmem [resolvable:$true] %s261_s7 }
  0x7c   :  { %s3975_s10 = scalar_lea.vmem %s240_s1, 16  ;;  %s3979_s20 = scalar_lea.vmem %s240_s1, 32 }
  0x7d   :  { %p3976_p2 = scmp.ne.s32.totalorder %s240_s1, %s3975_s10  ;;  %p3980_p3 = scmp.lt.s32.totalorder %s240_s1, %s240_s1 }
  0x7e   :  { %p3981_p4 = scmp.lt.s32.totalorder %s3979_s20, %s3975_s10 }
  0x80   :  { %p3982_p5 = por %p3981_p4, %p3980_p3 }
  0x82   :  { %p3983_p6 = pnand %p3982_p5, %p3976_p2 }
  0x84   :  { %3986 = shalt.err (!%p3983_p6)
}
  0x85   :  { %242 = dma.hbm_to_vmem [thread:$0]  %s4443_s25, 16, %s240_s1, [#allocation25]  }
  0x86   :  { %s3995_s11 = scalar_lea.vmem %s262_s7, 16  ;;  %s3999_s8 = scalar_lea.vmem %s262_s7, 32 }
  0x87   :  { %p3996_p7 = scmp.ne.s32.totalorder %s262_s7, %s3995_s11  ;;  %p4000_p8 = scmp.lt.s32.totalorder %s262_s7, %s262_s7 }
  0x88   :  { %p4001_p9 = scmp.lt.s32.totalorder %s3999_s8, %s3995_s11 }
  0x8a   :  { %p4002_p10 = por %p4001_p9, %p4000_p8 }
  0x8c   :  { %p4003_p11 = pnand %p4002_p10, %p3996_p7 }
  0x8e   :  { %4006 = shalt.err (!%p4003_p11)
}
  0x8f   :  { %264 = dma.hbm_to_vmem [thread:$0]  %s4453_s21, 16, %s262_s7, [#allocation28]  }
  0x90   :  { %s4309_s4 = smov [#allocation30]   ;;  %s4310_s18 = smov [#allocation3]  }
  0x91   :  { %s283_s16 = sshll.u32 %s4309_s4, 4  ;;  %s87_s22 = sshll.u32 %s4310_s18, 4  ;;  %s284_s16 = int_to_ptr.vmem [resolvable:$true] %s283_s16  ;;  %s88_s22 = int_to_ptr.vmem [resolvable:$true] %s87_s22 }
  0x92   :  { %s4015_s23 = scalar_lea.vmem %s284_s16, 16  ;;  %s4019_s0 = scalar_lea.vmem %s284_s16, 32 }
  0x93   :  { %p4016_p12 = scmp.ne.s32.totalorder %s284_s16, %s4015_s23  ;;  %p4020_p13 = scmp.lt.s32.totalorder %s284_s16, %s284_s16 }
  0x94   :  { %p4021_p0 = scmp.lt.s32.totalorder %s4019_s0, %s4015_s23 }
  0x96   :  { %p4022_p1 = por %p4021_p0, %p4020_p13 }
  0x98   :  { %p4023_p2 = pnand %p4022_p1, %p4016_p12 }
  0x9a   :  { %4026 = shalt.err (!%p4023_p2)
}
  0x9b   :  { %286 = dma.hbm_to_vmem [thread:$0]  %s4468_s30, 16, %s284_s16, [#allocation31]  }
  0x9c   :  { %s4035_s25 = scalar_lea.vmem %s88_s22, 16  ;;  %s4039_s26 = scalar_lea.vmem %s88_s22, 32 }
  0x9d   :  { %p4036_p3 = scmp.ne.s32.totalorder %s88_s22, %s4035_s25  ;;  %p4040_p4 = scmp.lt.s32.totalorder %s88_s22, %s88_s22 }
  0x9e   :  { %p4041_p5 = scmp.lt.s32.totalorder %s4039_s26, %s4035_s25 }
  0xa0   :  { %p4042_p6 = por %p4041_p5, %p4040_p4 }
  0xa2   :  { %p4043_p7 = pnand %p4042_p6, %p4036_p3 }
  0xa4   :  { %4046 = shalt.err (!%p4043_p7)
}
  0xa5   :  { %90 = dma.hbm_to_vmem [thread:$0]  %s4348_s13, 16, %s88_s22, [#allocation4]  }
  0xa6   :  { %s4311_s21 = smov [#allocation8]   ;;  %s4312_s19 = smov [#allocation11]  }
  0xa7   :  { %s112_s28 = sshll.u32 %s4311_s21, 4  ;;  %s135_s6 = sshll.u32 %s4312_s19, 4  ;;  %s113_s28 = int_to_ptr.vmem [resolvable:$true] %s112_s28  ;;  %s136_s6 = int_to_ptr.vmem [resolvable:$true] %s135_s6 }
  0xa8   :  { %s4055_s1 = scalar_lea.vmem %s113_s28, 256  ;;  %p4060_p9 = scmp.lt.s32.totalorder %s113_s28, %s113_s28 }
  0xa9   :  { %p4056_p8 = scmp.ne.s32.totalorder %s113_s28, %s4055_s1  ;;  %p4061_p10 = scmp.lt.s32.totalorder %s4055_s1, %s4055_s1 }
  0xab   :  { %p4062_p11 = por %p4061_p10, %p4060_p9 }
  0xad   :  { %p4063_p12 = pnand %p4062_p11, %p4056_p8 }
  0xaf   :  { %4066 = shalt.err (!%p4063_p12)
}
  0xb0   :  { %118 = dma.hbm_to_vmem [thread:$0]  %s4373_s3, 256, %s113_s28, [#allocation7], %s4303_s17, %s4303_s17, %s4304_s15  }
  0xb1   :  { %s4075_s30 = scalar_lea.vmem %s136_s6, 16  ;;  %s4079_s13 = scalar_lea.vmem %s136_s6, 32 }
  0xb2   :  { %p4076_p13 = scmp.ne.s32.totalorder %s136_s6, %s4075_s30  ;;  %p4080_p0 = scmp.lt.s32.totalorder %s136_s6, %s136_s6 }
  0xb3   :  { %p4081_p1 = scmp.lt.s32.totalorder %s4079_s13, %s4075_s30 }
  0xb5   :  { %p4082_p2 = por %p4081_p1, %p4080_p0 }
  0xb7   :  { %p4083_p3 = pnand %p4082_p2, %p4076_p13 }
  0xb9   :  { %4086 = shalt.err (!%p4083_p3)
}
  0xba   :  { %138 = dma.hbm_to_vmem [thread:$0]  %s4383_s14, 16, %s136_s6, [#allocation10]  }
  0xbb   :  { %s4313_s2 = smov [#allocation14]   ;;  %s4314_s10 = smov [#allocation17]  }
  0xbc   :  { %s157_s7 = sshll.u32 %s4313_s2, 4  ;;  %s179_s20 = sshll.u32 %s4314_s10, 4  ;;  %s158_s7 = int_to_ptr.vmem [resolvable:$true] %s157_s7  ;;  %s180_s20 = int_to_ptr.vmem [resolvable:$true] %s179_s20 }
  0xbd   :  { %s4095_s11 = scalar_lea.vmem %s158_s7, 16  ;;  %s4099_s8 = scalar_lea.vmem %s158_s7, 32 }
  0xbe   :  { %p4096_p4 = scmp.ne.s32.totalorder %s158_s7, %s4095_s11  ;;  %p4100_p5 = scmp.lt.s32.totalorder %s158_s7, %s158_s7 }
  0xbf   :  { %p4101_p6 = scmp.lt.s32.totalorder %s4099_s8, %s4095_s11 }
  0xc1   :  { %p4102_p7 = por %p4101_p6, %p4100_p5 }
  0xc3   :  { %p4103_p8 = pnand %p4102_p7, %p4096_p4 }
  0xc5   :  { %4106 = shalt.err (!%p4103_p8)
}
  0xc6   :  { %160 = dma.hbm_to_vmem [thread:$0]  %s4393_s24, 16, %s158_s7, [#allocation13]  }
  0xc7   :  { %s4115_s3 = scalar_lea.vmem %s180_s20, 16  ;;  %s4119_s4 = scalar_lea.vmem %s180_s20, 32 }
  0xc8   :  { %p4116_p9 = scmp.ne.s32.totalorder %s180_s20, %s4115_s3  ;;  %p4120_p10 = scmp.lt.s32.totalorder %s180_s20, %s180_s20 }
  0xc9   :  { %p4121_p11 = scmp.lt.s32.totalorder %s4119_s4, %s4115_s3 }
  0xcb   :  { %p4122_p12 = por %p4121_p11, %p4120_p10 }
  0xcd   :  { %p4123_p13 = pnand %p4122_p12, %p4116_p9 }
  0xcf   :  { %4126 = shalt.err (!%p4123_p13)
}
  0xd0   :  { %182 = dma.hbm_to_vmem [thread:$0]  %s4408_s12, 16, %s180_s20, [#allocation16]  }
  0xd1   :  { %s4315_s14 = smov [#allocation20]   ;;  %s4316_s18 = smov [#allocation23]  }
  0xd2   :  { %s198_s16 = sshll.u32 %s4315_s14, 4  ;;  %s224_s22 = sshll.u32 %s4316_s18, 4  ;;  %s199_s16 = int_to_ptr.vmem [resolvable:$true] %s198_s16  ;;  %s225_s22 = int_to_ptr.vmem [resolvable:$true] %s224_s22 }
  0xd3   :  { %s4135_s23 = scalar_lea.vmem %s199_s16, 256  ;;  %p4140_p1 = scmp.lt.s32.totalorder %s199_s16, %s199_s16 }
  0xd4   :  { %p4136_p0 = scmp.ne.s32.totalorder %s199_s16, %s4135_s23  ;;  %p4141_p2 = scmp.lt.s32.totalorder %s4135_s23, %s4135_s23 }
  0xd6   :  { %p4142_p3 = por %p4141_p2, %p4140_p1 }
  0xd8   :  { %p4143_p4 = pnand %p4142_p3, %p4136_p0 }
  0xda   :  { %4146 = shalt.err (!%p4143_p4)
}
  0xdb   :  { %s4964_s24 = sld [smem:[#allocation51_spill]]  ;;  %s4155_s0 = scalar_lea.vmem %s225_s22, 256 }
  0xdc   :  { %p4156_p5 = scmp.ne.s32.totalorder %s225_s22, %s4155_s0  ;;  %p4160_p6 = scmp.lt.s32.totalorder %s225_s22, %s225_s22 }
  0xdd   :  { %p4161_p7 = scmp.lt.s32.totalorder %s4155_s0, %s4155_s0 }
  0xdf   :  { %p4162_p8 = por %p4161_p7, %p4160_p6 }
  0xe1   :  { %204 = dma.hbm_to_vmem [thread:$0]  %s4964_s24, 256, %s199_s16, [#allocation19], %s4303_s17, %s4303_s17, %s4304_s15  }
  0xe2   :  { %p4163_p9 = pnand %p4162_p8, %p4156_p5 }
  0xe4   :  { %4166 = shalt.err (!%p4163_p9)
}
  0xe5   :  { %s4965_s12 = sld [smem:[#allocation53_spill]]  ;;  %s4317_s25 = smov [#allocation26]  }
  0xe6   :  { %s248_s26 = sshll.u32 %s4317_s25, 4  ;;  %s4318_s21 = smov [#allocation29]   ;;  %s249_s26 = int_to_ptr.vmem [resolvable:$true] %s248_s26 }
  0xe7   :  { %s273_s28 = sshll.u32 %s4318_s21, 4  ;;  %s4175_s19 = scalar_lea.vmem %s249_s26, 256  ;;  %s274_s28 = int_to_ptr.vmem [resolvable:$true] %s273_s28 }
  0xe8   :  { %p4176_p10 = scmp.ne.s32.totalorder %s249_s26, %s4175_s19  ;;  %p4180_p11 = scmp.lt.s32.totalorder %s249_s26, %s249_s26 }
  0xe9   :  { %p4181_p12 = scmp.lt.s32.totalorder %s4175_s19, %s4175_s19 }
  0xeb   :  { %230 = dma.hbm_to_vmem [thread:$0]  %s4965_s12, 256, %s225_s22, [#allocation22], %s4303_s17, %s4303_s17, %s4304_s15  }
  0xec   :  { %p4182_p13 = por %p4181_p12, %p4180_p11 }
  0xee   :  { %p4183_p0 = pnand %p4182_p13, %p4176_p10 }
  0xf0   :  { %4186 = shalt.err (!%p4183_p0)
}
  0xf1   :  { %s4966_s6 = sld [smem:[#allocation55_spill]]  ;;  %s4195_s1 = scalar_lea.vmem %s274_s28, 16 }
  0xf2   :  { %p4196_p1 = scmp.ne.s32.totalorder %s274_s28, %s4195_s1  ;;  %s4199_s30 = scalar_lea.vmem %s274_s28, 32 }
  0xf3   :  { %p4200_p2 = scmp.lt.s32.totalorder %s274_s28, %s274_s28  ;;  %p4201_p3 = scmp.lt.s32.totalorder %s4199_s30, %s4195_s1 }
  0xf5   :  { %p4202_p4 = por %p4201_p3, %p4200_p2 }
  0xf7   :  { %254 = dma.hbm_to_vmem [thread:$0]  %s4966_s6, 256, %s249_s26, [#allocation25], %s4303_s17, %s4303_s17, %s4304_s15  }
  0xf8   :  { %p4203_p5 = pnand %p4202_p4, %p4196_p1 }
  0xfa   :  { %4206 = shalt.err (!%p4203_p5)
}
  0xfb   :  { %s4967_s13 = sld [smem:[#allocation57_spill]]  ;;  %s4319_s2 = smov [#allocation32]  }
  0xfc   :  { %s293_s7 = sshll.u32 %s4319_s2, 4  ;;  %s294_s7 = int_to_ptr.vmem [resolvable:$true] %s293_s7 }
  0xfd   :  { %s4215_s10 = scalar_lea.vmem %s294_s7, 16  ;;  %s4219_s20 = scalar_lea.vmem %s294_s7, 32 }
  0xfe   :  { %p4216_p6 = scmp.ne.s32.totalorder %s294_s7, %s4215_s10  ;;  %p4220_p7 = scmp.lt.s32.totalorder %s294_s7, %s294_s7 }
  0xff   :  { %p4221_p8 = scmp.lt.s32.totalorder %s4219_s20, %s4215_s10 }
 0x101   :  { %276 = dma.hbm_to_vmem [thread:$0]  %s4967_s13, 16, %s274_s28, [#allocation28]  }
 0x102   :  { %p4222_p9 = por %p4221_p8, %p4220_p7 }
 0x104   :  { %p4223_p10 = pnand %p4222_p9, %p4216_p6 }
 0x106   :  { %4226 = shalt.err (!%p4223_p10)
}
 0x107   :  { %296 = dma.hbm_to_vmem [thread:$0]  %s4473_s9, 16, %s294_s7, [#allocation31]  }
 0x108   :  { %4247 = dma.done.wait [#allocation4], 16  }
 0x109   :  { %4248 = vsyncadd [#allocation4], 4294967280 }
 0x10a   :  { %4249 = dma.done.wait [#allocation7], 272  }
 0x10b   :  { %4250 = vsyncadd [#allocation7], 4294967024 }
 0x10c   :  { %4251 = dma.done.wait [#allocation10], 32  }
 0x10d   :  { %4252 = vsyncadd [#allocation10], 4294967264 }
 0x10e   :  { %4253 = dma.done.wait [#allocation13], 272  }
 0x10f   :  { %4254 = vsyncadd [#allocation13], 4294967024 }
 0x110   :  { %4255 = dma.done.wait [#allocation16], 32  }
 0x111   :  { %4256 = vsyncadd [#allocation16], 4294967264 }
 0x112   :  { %4257 = dma.done.wait [#allocation19], 272  }
 0x113   :  { %4258 = vsyncadd [#allocation19], 4294967024 }
 0x114   :  { %4259 = dma.done.wait [#allocation22], 512  }
 0x115   :  { %4260 = vsyncadd [#allocation22], 4294966784 }
 0x116   :  { %4261 = dma.done.wait [#allocation25], 272  }
 0x117   :  { %4262 = vsyncadd [#allocation25], 4294967024 }
 0x118   :  { %4263 = dma.done.wait [#allocation28], 32  }
 0x119   :  { %4264 = vsyncadd [#allocation28], 4294967264 }
 0x11a   :  { %4265 = dma.done.wait [#allocation31], 32  }
 0x11b   :  { %4266 = vsyncadd [#allocation31], 4294967264  ;;  %s4968_s9 = sld [smem:[#allocation45_spill]]  ;;  %vm365_vm0 = vcmask 261120   ;;  %v4320_v16 = vmov 0.0   ;;  %vm4321_vm1 = vmmov 0  }
 0x11c   :  { %s4969_s17 = sld [smem:[#allocation47_spill]]  ;;  %3438 = vmatprep.subr.bf16.mxu0 %v4320_v16  ;;  %3446 = vmatprep.subr.bf16.mxu1 %v4320_v16  ;;  %v3225_v27 = vld [vmem:[#allocation3] ss:$0 sm:$0xff]  ;;  %v3226_v31 = vld [vmem:[#allocation6] ss:$0 sm:$0xff]  ;;  %vm584_vm2 = vcmask 64512  }
 0x11d   :  { %s4970_s15 = sld [smem:[#allocation48_spill]]  ;;  %3442 = vmatprep.mubr.msk.bf16.mxu0 %vm4321_vm1, %v4320_v16  ;;  %3450 = vmatprep.mubr.msk.bf16.mxu1 %vm4321_vm1, %v4320_v16  ;;  %s4322_s8 = smov 120   ;;  %vm676_vm3 = vcmask 130048   ;;  %vm996_vm4 = vcmask 130112   ;;  %vm1211_vm5 = vcmask 195712   ;;  %vm1426_vm6 = vcmask 261312  }
 0x11e   :  { %s4971_s11 = sld [smem:[#allocation49_spill]]  ;;  %s4323_s3 = smov 112   ;;  %vm1657_vm7 = vcmask 523264  }
 0x11f   :  { %s4972_s4 = sld [smem:[#allocation46_spill]]  ;;  %s4324_s14 = smov 104  }
 0x120   :  { %s4325_s16 = smov 8   ;;  %s4326_s18 = smov 16  }
 0x121   :  { %v4528_v0 = vld [vmem:[%s4968_s9] sm:$0xff]  ;;  %v4531_v1 = vld [vmem:[%s4968_s9 + $0x8] sm:$0xff]  ;;  %s4327_s22 = smov 24   ;;  %s4973_s23 = sld [smem:[#allocation50_spill]] }
 0x122   :  { %v366_v2 = vsel %vm365_vm0, %v4528_v0, 0.0  ;;  %v369_v3 = vsel %vm365_vm0, %v4531_v1, 0.0  ;;  %v3723_v14 = vld [vmem:[%s4969_s17 + $0x8] sm:$0xff]   ;;  %v3725_v17 = vld [vmem:[%s4969_s17] sm:$0xff]   ;;  %s4974_s24 = sld [smem:[#allocation52_spill]] }
 0x123   :  { %367 = vadd.xlane.f32.xlu0 %v366_v2  ;;  %v3724_v15 = vld [vmem:[%s4970_s15 + $0x8] sm:$0xff]   ;;  %3439 = vmatpush3.bf16.msra.mxu0 %v3723_v14  ;;  %v3726_v18 = vld [vmem:[%s4970_s15] sm:$0xff]   ;;  %s4975_s0 = sld [smem:[#allocation54_spill]] }
 0x124   :  { %3447 = vmatpush3.bf16.msra.mxu1 %v3724_v15  ;;  %3440 = vmatprep.subr.bf16.mxu0 %v4320_v16  ;;  %v3727_v35 = vld [vmem:[%s4971_s11 + $0x8] sm:$0xff]   ;;  %v3728_v37 = vld [vmem:[%s4971_s11] sm:$0xff]   ;;  %s4976_s12 = sld [smem:[#allocation56_spill]] }
 0x125   :  { %3448 = vmatprep.subr.bf16.mxu1 %v4320_v16  ;;  %v4622_v59 = vld [vmem:[%s4972_s4 + $0x8] sm:$0xff]  ;;  %v4625_v62 = vld [vmem:[%s4972_s4] sm:$0xff] }
 0x127   :  { %370 = vadd.xlane.f32.xlu0 %v369_v3  ;;  %3441 = vmatpush3.bf16.msra.mxu0 %v3725_v17 }
 0x128   :  { %3449 = vmatpush3.bf16.msra.mxu1 %v3726_v18  ;;  %3454 = vmatprep.subr.bf16.mxu0 %v4320_v16 }
 0x1ac   :  { %v368_v4 = vpop.xlane.xlu0 %367 }
 0x1ad   :  { %v373_v5 = vmul.f32 0.03125, %v368_v4 }
 0x1af   :  { %v375_v6 = vsub.f32 %v4528_v0, %v373_v5 }
 0x1b0   :  { %v371_v7 = vpop.xlane.xlu0 %370 }
 0x1b1   :  { %v374_v8 = vmul.f32 0.03125, %v371_v7  ;;  %v377_v9 = vmul.f32 %v375_v6, %v375_v6 }
 0x1b3   :  { %v376_v10 = vsub.f32 %v4531_v1, %v374_v8  ;;  %v379_v11 = vsel %vm365_vm0, %v377_v9, 0.0 }
 0x1b4   :  { %380 = vadd.xlane.f32.xlu1 %v379_v11 }
 0x1b5   :  { %v378_v12 = vmul.f32 %v376_v10, %v376_v10 }
 0x1b7   :  { %v382_v13 = vsel %vm365_vm0, %v378_v12, 0.0 }
 0x1b8   :  { %383 = vadd.xlane.f32.xlu1 %v382_v13 }
 0x23d   :  { %v381_v19 = vpop.xlane.xlu1 %380 }
 0x23e   :  { %v385_v20 = vmul.f32 0.03125, %v381_v19 }
 0x240   :  { %v387_v21 = vadd.f32 1e-05, %v385_v20 }
 0x241   :  { %v384_v22 = vpop.xlane.xlu1 %383 }
 0x242   :  { %3753 = vrsqrt.f32 %v387_v21  ;;  %v386_v23 = vmul.f32 0.03125, %v384_v22 }
 0x244   :  { %v388_v24 = vadd.f32 1e-05, %v386_v23 }
 0x246   :  { %3755 = vrsqrt.f32 %v388_v24 }
 0x24f   :  { %v3754_v25 = vpop.eup %3753 }
 0x250   :  { %v391_v26 = vmul.f32 %v3754_v25, %v375_v6 }
 0x252   :  { %v399_v30 = vmul.f32 %v3225_v27, %v391_v26 }
 0x253   :  { %v3756_v28 = vpop.eup %3755 }
 0x254   :  { %v392_v29 = vmul.f32 %v3756_v28, %v376_v10  ;;  %v407_v33 = vadd.f32 %v3226_v31, %v399_v30 }
 0x256   :  { %v400_v32 = vmul.f32 %v3225_v27, %v392_v29 }
 0x258   :  { %v408_v34 = vadd.f32 %v3226_v31, %v400_v32 }
 0x25a   :  { %v409_v36 = vpack.c.bf16 %v408_v34, %v407_v33 }
 0x25c   :  { %3443 = vmatmul.mubr.msk.bf16.vlgmr.msra.gmra.mxu0 %vm365_vm0, %v409_v36  ;;  %3451 = vmatmul.mubr.msk.bf16.vlgmr.msra.gmra.mxu1 %vm365_vm0, %v409_v36 }
 0x25d   :  { %3455 = vmatpush3.bf16.msra.mxu0 %v3727_v35  ;;  %3458 = vmatprep.mubr.msk.bf16.mxu0 %vm4321_vm1, %v4320_v16 }
 0x25e   :  { %3456 = vmatprep.subr.bf16.mxu0 %v4320_v16 }
 0x261   :  { %3457 = vmatpush3.bf16.msra.mxu0 %v3728_v37 }
 0x264   :  { %3459 = vmatmul.mubr.msk.bf16.vlgmr.msra.gmra.mxu0 %vm365_vm0, %v409_v36 }
 0x31c   :  { %v4562_v38 = vpop.f32.mrf.mxu0  ;;  %v4564_v39 = vpop.f32.mrf.mxu1 }
 0x31d   :  { %786 = vrot.lane.b32.xlu1 %v4564_v39, %s4322_s8  ;;  %3466 = vmatprep.mubr.msk.f32.mxu1 %vm584_vm2, %v4562_v38 }
 0x31e   :  { %v3444_v40 = vpop.f32.mrf.mxu0  ;;  %v3452_v41 = vpop.f32.mrf.mxu1 }
 0x320   :  { %v4570_v42 = vpop.f32.mrf.mxu0  ;;  %v4572_v43 = vpop.f32.mrf.mxu1 }
 0x321   :  { %788 = vrot.lane.b32.xlu0 %v4572_v43, %s4322_s8  ;;  %3462 = vmatprep.subr.msk.mxu1 %vm584_vm2, %v4572_v43 }
 0x322   :  { %782 = vrot.lane.b32.xlu1 %v4562_v38, %s4322_s8  ;;  %v3445_v44 = vpop.f32.mrf.mxu0  ;;  %v3453_v45 = vpop.f32.mrf.mxu1  ;;  %3463 = vmatpush3.xpose.msk.msra.mxu1 %vm584_vm2, %v4572_v43 }
 0x323   :  { %3464 = vmatprep.subr.msk.mxu1 %vm584_vm2, %v4564_v39 }
 0x324   :  { %v4584_v46 = vpop.f32.mrf.mxu0 }
 0x325   :  { %784 = vrot.lane.b32.xlu0 %v4570_v42, %s4322_s8 }
 0x326   :  { %1005 = vrot.lane.b32.xlu1 %v4572_v43, %s4323_s3  ;;  %v3460_v47 = vpop.f32.mrf.mxu0  ;;  %3465 = vmatpush3.xpose.msk.msra.mxu1 %vm584_vm2, %v4564_v39 }
 0x328   :  { %v4592_v48 = vpop.f32.mrf.mxu0 }
 0x329   :  { %999 = vrot.lane.b32.xlu0 %v4562_v38, %s4323_s3  ;;  %3467 = vmatmul.mubr.msk.f32.vlgmr.msra.gmra.mxu1 %vm584_vm2, %v4570_v42 }
 0x32a   :  { %1003 = vrot.lane.b32.xlu1 %v4564_v39, %s4323_s3  ;;  %3469 = vmatprep.subr.mxu1 %v4592_v48  ;;  %v3461_v49 = vpop.f32.mrf.mxu0 }
 0x32b   :  { %3470 = vmatpush3.msra.mxu1 %v4592_v48 }
 0x32c   :  { %3471 = vmatprep.subr.mxu1 %v4584_v46 }
 0x32d   :  { %3472 = vmatpush3.msra.mxu1 %v4584_v46 }
 0x32e   :  { %1001 = vrot.lane.b32.xlu1 %v4570_v42, %s4323_s3 }
 0x38f   :  { %v787_v50 = vpop.permute.xlu1 %786 }
 0x393   :  { %v789_v51 = vpop.permute.xlu0 %788 }
 0x394   :  { %v783_v52 = vpop.permute.xlu1 %782  ;;  %3476 = vmatprep.subr.msk.mxu0 %vm584_vm2, %v789_v51 }
 0x395   :  { %3480 = vmatprep.mubr.msk.f32.mxu0 %vm584_vm2, %v783_v52  ;;  %3477 = vmatpush3.xpose.msk.msra.mxu0 %vm584_vm2, %v789_v51 }
 0x396   :  { %3478 = vmatprep.subr.msk.mxu0 %vm584_vm2, %v787_v50 }
 0x397   :  { %v785_v53 = vpop.permute.xlu0 %784 }
 0x398   :  { %v1006_v54 = vpop.permute.xlu1 %1005 }
 0x399   :  { %3479 = vmatpush3.xpose.msk.msra.mxu0 %vm584_vm2, %v787_v50 }
 0x39a   :  { %3490 = vmatprep.subr.msk.mxu0 %vm584_vm2, %v1006_v54 }
 0x39b   :  { %v1000_v55 = vpop.permute.xlu0 %999 }
 0x39c   :  { %3481 = vmatmul.mubr.msk.f32.vlgmr.msra.gmra.mxu0 %vm584_vm2, %v785_v53  ;;  %v1004_v56 = vpop.permute.xlu1 %1003 }
 0x39d   :  { %3491 = vmatpush3.xpose.msk.msra.mxu0 %vm584_vm2, %v1006_v54  ;;  %3494 = vmatprep.mubr.msk.f32.mxu0 %vm584_vm2, %v1000_v55 }
 0x39e   :  { %3492 = vmatprep.subr.msk.mxu0 %vm584_vm2, %v1004_v56 }
 0x3a0   :  { %v1002_v57 = vpop.permute.xlu1 %1001 }
 0x3a1   :  { %3493 = vmatpush3.xpose.msk.msra.mxu0 %vm584_vm2, %v1004_v56 }
 0x3a2   :  { %3518 = vmatprep.subr.bf16.mxu0 %v4320_v16 }
 0x3a4   :  { %3495 = vmatmul.mubr.msk.f32.vlgmr.msra.gmra.mxu0 %vm584_vm2, %v1002_v57 }
 0x3a5   :  { %3522 = vmatprep.mubr.msk.bf16.mxu0 %vm4321_vm1, %v4320_v16 }
 0x3e9   :  { %v3468_v58 = vpop.f32.mrf.mxu1 }
 0x3ea   :  { %v673_v60 = vmul.f32 0.35355338, %v3468_v58 }
 0x3eb   :  { %v663_v61 = vpop.f32.mrf.mxu1 }
 0x3ec   :  { %v672_v63 = vmul.f32 0.35355338, %v663_v61  ;;  %v675_v2 = vadd.f32 %v673_v60, %v4622_v59 }
 0x3ee   :  { %v680_v3 = vsel %vm676_vm3, %v675_v2, -inf  ;;  %v674_v4 = vadd.f32 %v672_v63, %v4625_v62 }
 0x3ef   :  { %681 = vmax.xlane.f32.xlu1 %v680_v3 }
 0x3f0   :  { %v677_v5 = vsel %vm676_vm3, %v674_v4, -inf }
 0x3f1   :  { %678 = vmax.xlane.f32.xlu0 %v677_v5 }
 0x45c   :  { %v3482_v6 = vpop.f32.mrf.mxu0 }
 0x45d   :  { %v874_v7 = vmul.f32 0.35355338, %v3482_v6 }
 0x45e   :  { %v864_v8 = vpop.f32.mrf.mxu0 }
 0x45f   :  { %v873_v9 = vmul.f32 0.35355338, %v864_v8  ;;  %v876_v10 = vadd.f32 %v874_v7, %v4622_v59 }
 0x461   :  { %v880_v11 = vsel %vm676_vm3, %v876_v10, -inf  ;;  %v875_v12 = vadd.f32 %v873_v9, %v4625_v62 }
 0x462   :  { %881 = vmax.xlane.f32.xlu0 %v880_v11 }
 0x463   :  { %v877_v15 = vsel %vm676_vm3, %v875_v12, -inf }
 0x464   :  { %v3496_v13 = vpop.f32.mrf.mxu0 }
 0x465   :  { %v1091_v14 = vmul.f32 0.35355338, %v3496_v13 }
 0x466   :  { %v1081_v17 = vpop.f32.mrf.mxu0  ;;  %878 = vmax.xlane.f32.xlu0 %v877_v15 }
 0x467   :  { %v1090_v18 = vmul.f32 0.35355338, %v1081_v17  ;;  %v1093_v19 = vadd.f32 %v1091_v14, %v4622_v59 }
 0x469   :  { %v1097_v20 = vsel %vm676_vm3, %v1093_v19, -inf  ;;  %v1092_v21 = vadd.f32 %v1090_v18, %v4625_v62 }
 0x46a   :  { %1098 = vmax.xlane.f32.xlu1 %v1097_v20 }
 0x46b   :  { %v1094_v22 = vsel %vm676_vm3, %v1092_v21, -inf }
 0x46c   :  { %1095 = vmax.xlane.f32.xlu0 %v1094_v22 }
 0x478   :  { %v682_v25 = vpop.xlane.xlu1 %681 }
 0x479   :  { %v684_v27 = vsub.f32 %v675_v2, %v682_v25 }
 0x47a   :  { %v679_v23 = vpop.xlane.xlu0 %678 }
 0x47b   :  { %901 = vrot.lane.b32.xlu1 %v4584_v46, %s4322_s8  ;;  %v683_v24 = vsub.f32 %v674_v4, %v679_v23  ;;  %v687_v28 = vmul.f32 1.442695, %v684_v27 }
 0x47d   :  { %v685_v26 = vmul.f32 1.442695, %v683_v24 }
 0x47f   :  { %1118 = vrot.lane.b32.xlu1 %v4592_v48, %s4323_s3  ;;  %3757 = vpow2.f32 %v685_v26 }
 0x480   :  { %3759 = vpow2.f32 %v687_v28 }
 0x482   :  { %903 = vrot.lane.b32.xlu0 %v4592_v48, %s4322_s8 }
 0x483   :  { %1116 = vrot.lane.b32.xlu1 %v4584_v46, %s4323_s3 }
 0x48c   :  { %v3758_v29 = vpop.eup %3757 }
 0x48d   :  { %v689_v30 = vsel %vm676_vm3, %v3758_v29, 0.0  ;;  %v3760_v31 = vpop.eup %3759 }
 0x48e   :  { %v692_v32 = vsel %vm676_vm3, %v3760_v31, 0.0 }
 0x4a1   :  { %690 = vadd.xlane.f32.xlu0 %v689_v30 }
 0x4a7   :  { %693 = vadd.xlane.f32.xlu1 %v692_v32 }
 0x4eb   :  { %v882_v33 = vpop.xlane.xlu0 %881 }
 0x4ec   :  { %v884_v34 = vsub.f32 %v876_v10, %v882_v33 }
 0x4ee   :  { %v887_v35 = vmul.f32 1.442695, %v884_v34 }
 0x4ef   :  { %v879_v36 = vpop.xlane.xlu0 %878 }
 0x4f0   :  { %3761 = vpow2.f32 %v887_v35  ;;  %v883_v37 = vsub.f32 %v875_v12, %v879_v36 }
 0x4f2   :  { %v885_v40 = vmul.f32 1.442695, %v883_v37 }
 0x4f3   :  { %v1099_v41 = vpop.xlane.xlu1 %1098 }
 0x4f4   :  { %3763 = vpow2.f32 %v885_v40  ;;  %v1101_v44 = vsub.f32 %v1093_v19, %v1099_v41 }
 0x4f5   :  { %v1096_v45 = vpop.xlane.xlu0 %1095 }
 0x4f6   :  { %v1104_v47 = vmul.f32 1.442695, %v1101_v44  ;;  %v1100_v49 = vsub.f32 %v1092_v21, %v1096_v45 }
 0x4f7   :  { %v902_v61 = vpop.permute.xlu1 %901 }
 0x4f8   :  { %3765 = vpow2.f32 %v1104_v47  ;;  %v1102_v50 = vmul.f32 1.442695, %v1100_v49 }
 0x4f9   :  { %v904_v51 = vpop.permute.xlu0 %903 }
 0x4fa   :  { %3767 = vpow2.f32 %v1102_v50  ;;  %3483 = vmatprep.subr.mxu1 %v904_v51 }
 0x4fb   :  { %v1119_v63 = vpop.permute.xlu1 %1118 }
 0x4fd   :  { %v3762_v52 = vpop.eup %3761 }
 0x4fe   :  { %v892_v53 = vsel %vm676_vm3, %v3762_v52, 0.0 }
 0x4ff   :  { %893 = vadd.xlane.f32.xlu1 %v892_v53  ;;  %v1117_v3 = vpop.permute.xlu1 %1116 }
 0x501   :  { %v3764_v54 = vpop.eup %3763 }
 0x502   :  { %v889_v55 = vsel %vm676_vm3, %v3764_v54, 0.0 }
 0x503   :  { %890 = vadd.xlane.f32.xlu0 %v889_v55 }
 0x505   :  { %v3766_v56 = vpop.eup %3765 }
 0x506   :  { %v1109_v57 = vsel %vm676_vm3, %v3766_v56, 0.0 }
 0x507   :  { %v3768_v58 = vpop.eup %3767  ;;  %1110 = vadd.xlane.f32.xlu1 %v1109_v57 }
 0x508   :  { %v1106_v60 = vsel %vm676_vm3, %v3768_v58, 0.0 }
 0x509   :  { %1107 = vadd.xlane.f32.xlu0 %v1106_v60 }
 0x518   :  { %1218 = vrot.lane.b32.xlu1 %v4564_v39, %s4324_s14 }
 0x51c   :  { %1216 = vrot.lane.b32.xlu1 %v4570_v42, %s4324_s14 }
 0x51f   :  { %1220 = vrot.lane.b32.xlu0 %v4572_v43, %s4324_s14 }
 0x523   :  { %1214 = vrot.lane.b32.xlu0 %v4562_v38, %s4324_s14 }
 0x52a   :  { %v691_v2 = vpop.xlane.xlu0 %690 }
 0x52b   :  { %3769 = vrcp.f32 %v691_v2  ;;  %v3729_v2 = vld [vmem:[#allocation8 + $0x8] sm:$0xff]  }
 0x52c   :  { %3519 = vmatpush3.bf16.msra.mxu0 %v3729_v2 }
 0x52d   :  { %3520 = vmatprep.subr.bf16.mxu0 %v4320_v16 }
 0x530   :  { %v694_v4 = vpop.xlane.xlu1 %693 }
 0x531   :  { %3771 = vrcp.f32 %v694_v4 }
 0x538   :  { %v3770_v5 = vpop.eup %3769 }
 0x539   :  { %v697_v6 = vmul.f32 %v3770_v5, %v3758_v29 }
 0x53b   :  { %3473 = vmatprep.mubr.msk.f32.mxu1 %vm676_vm3, %v697_v6 }
 0x53e   :  { %v3772_v39 = vpop.eup %3771 }
 0x53f   :  { %v698_v7 = vmul.f32 %v3772_v39, %v3760_v31 }
 0x541   :  { %3474 = vmatmul.mubr.msk.f32.vlgmr.msra.gmra.mxu1 %vm676_vm3, %v698_v7 }
 0x542   :  { %3484 = vmatpush3.msra.mxu1 %v904_v51 }
 0x543   :  { %3485 = vmatprep.subr.mxu1 %v902_v61 }
 0x544   :  { %3486 = vmatpush3.msra.mxu1 %v902_v61 }
 0x545   :  { %3497 = vmatprep.subr.mxu1 %v1119_v63 }
 0x588   :  { %v894_v42 = vpop.xlane.xlu1 %893 }
 0x589   :  { %3773 = vrcp.f32 %v894_v42 }
 0x58c   :  { %v891_v38 = vpop.xlane.xlu0 %890 }
 0x58d   :  { %3775 = vrcp.f32 %v891_v38 }
 0x590   :  { %v1111_v43 = vpop.xlane.xlu1 %1110 }
 0x591   :  { %3777 = vrcp.f32 %v1111_v43 }
 0x592   :  { %v1108_v8 = vpop.xlane.xlu0 %1107 }
 0x593   :  { %3779 = vrcp.f32 %v1108_v8 }
 0x594   :  { %v1219_v20 = vpop.permute.xlu1 %1218 }
 0x596   :  { %v3774_v9 = vpop.eup %3773  ;;  %v1221_v13 = vpop.permute.xlu0 %1220 }
 0x597   :  { %v898_v12 = vmul.f32 %v3774_v9, %v3762_v52 }
 0x598   :  { %v1217_v21 = vpop.permute.xlu1 %1216 }
 0x59a   :  { %v3776_v10 = vpop.eup %3775  ;;  %v1215_v19 = vpop.permute.xlu0 %1214 }
 0x59b   :  { %v897_v11 = vmul.f32 %v3776_v10, %v3764_v54 }
 0x59d   :  { %3487 = vmatprep.mubr.msk.f32.mxu1 %vm676_vm3, %v897_v11 }
 0x59e   :  { %3488 = vmatmul.mubr.msk.f32.vlgmr.msra.gmra.mxu1 %vm676_vm3, %v898_v12  ;;  %v3778_v14 = vpop.eup %3777 }
 0x59f   :  { %3498 = vmatpush3.msra.mxu1 %v1119_v63  ;;  %v1115_v18 = vmul.f32 %v3778_v14, %v3766_v56 }
 0x5a0   :  { %v3780_v15 = vpop.eup %3779  ;;  %3499 = vmatprep.subr.mxu1 %v1117_v3 }
 0x5a1   :  { %3500 = vmatpush3.msra.mxu1 %v1117_v3  ;;  %v1114_v17 = vmul.f32 %v3780_v15, %v3768_v58  ;;  %v3730_v3 = vld [vmem:[#allocation8] sm:$0xff]  }
 0x5a2   :  { %3504 = vmatprep.subr.msk.mxu1 %vm584_vm2, %v1221_v13  ;;  %3521 = vmatpush3.bf16.msra.mxu0 %v3730_v3 }
 0x5a3   :  { %3501 = vmatprep.mubr.msk.f32.mxu1 %vm676_vm3, %v1114_v17  ;;  %3534 = vmatprep.subr.bf16.mxu0 %v4320_v16 }
 0x5a4   :  { %3502 = vmatmul.mubr.msk.f32.vlgmr.msra.gmra.mxu1 %vm676_vm3, %v1115_v18 }
 0x5a5   :  { %3505 = vmatpush3.xpose.msk.msra.mxu1 %vm584_vm2, %v1221_v13  ;;  %3508 = vmatprep.mubr.msk.f32.mxu1 %vm584_vm2, %v1215_v19 }
 0x5a6   :  { %3506 = vmatprep.subr.msk.mxu1 %vm584_vm2, %v1219_v20 }
 0x5a9   :  { %3507 = vmatpush3.xpose.msk.msra.mxu1 %vm584_vm2, %v1219_v20 }
 0x5ac   :  { %3509 = vmatmul.mubr.msk.f32.vlgmr.msra.gmra.mxu1 %vm584_vm2, %v1217_v21 }
 0x601   :  { %v3475_v22 = vpop.f32.mrf.mxu1 }
 0x602   :  { %781 = vst.msk [vmem:[#allocation2 + $0x8] sm:$0xff] %vm584_vm2, %v3475_v22 }
 0x603   :  { %v771_v23 = vpop.f32.mrf.mxu1 }
 0x604   :  { %780 = vst.msk [vmem:[#allocation2] sm:$0xff] %vm584_vm2, %v771_v23 }
 0x65e   :  { %v3489_v24 = vpop.f32.mrf.mxu1 }
 0x660   :  { %v979_v25 = vpop.f32.mrf.mxu1 }
 0x664   :  { %v3503_v26 = vpop.f32.mrf.mxu1 }
 0x666   :  { %v1194_v27 = vpop.f32.mrf.mxu1 }
 0x66c   :  { %v3510_v28 = vpop.f32.mrf.mxu1 }
 0x66d   :  { %v1306_v29 = vmul.f32 0.35355338, %v3510_v28 }
 0x66e   :  { %v1296_v30 = vpop.f32.mrf.mxu1 }
 0x66f   :  { %v1305_v31 = vmul.f32 0.35355338, %v1296_v30  ;;  %v1308_v32 = vadd.f32 %v1306_v29, %v4622_v59 }
 0x671   :  { %v1312_v33 = vsel %vm676_vm3, %v1308_v32, -inf  ;;  %v1307_v34 = vadd.f32 %v1305_v31, %v4625_v62 }
 0x672   :  { %1313 = vmax.xlane.f32.xlu1 %v1312_v33 }
 0x673   :  { %v1309_v35 = vsel %vm676_vm3, %v1307_v34, -inf }
 0x674   :  { %1310 = vmax.xlane.f32.xlu0 %v1309_v35 }
 0x683   :  { %1331 = vrot.lane.b32.xlu1 %v4584_v46, %s4324_s14 }
 0x687   :  { %990 = vrot.lane.b32.xlu1 %v979_v25, %s4325_s16  ;;  %v3732_v25 = vld [vmem:[#allocation12] sm:$0xff]  }
 0x68b   :  { %992 = vrot.lane.b32.xlu1 %v3489_v24, %s4325_s16  ;;  %v3731_v24 = vld [vmem:[#allocation12 + $0x8] sm:$0xff]  }
 0x68f   :  { %1207 = vrot.lane.b32.xlu1 %v3503_v26, %s4326_s18 }
 0x6fb   :  { %v1314_v36 = vpop.xlane.xlu1 %1313 }
 0x6fc   :  { %v1316_v37 = vsub.f32 %v1308_v32, %v1314_v36 }
 0x6fd   :  { %v1311_v40 = vpop.xlane.xlu0 %1310 }
 0x6fe   :  { %v1319_v41 = vmul.f32 1.442695, %v1316_v37  ;;  %v1315_v44 = vsub.f32 %v1307_v34, %v1311_v40  ;;  %v3263_v34 = vld [vmem:[#allocation9] ss:$0 sm:$0xff]  ;;  %v3264_v40 = vld [vmem:[#allocation11] ss:$0 sm:$0xff] }
 0x6ff   :  { %v1332_v45 = vpop.permute.xlu1 %1331 }
 0x700   :  { %3781 = vpow2.f32 %v1319_v41  ;;  %v1317_v47 = vmul.f32 1.442695, %v1315_v44 }
 0x702   :  { %3783 = vpow2.f32 %v1317_v47 }
 0x703   :  { %v991_v49 = vpop.permute.xlu1 %990 }
 0x704   :  { %997 = vst.msk [vmem:[#allocation2] sm:$0xff] %vm996_vm4, %v991_v49  ;;  %v3733_v49 = vld [vmem:[%s4973_s23 + $0x18] sm:$0xff]  }
 0x707   :  { %v993_v46 = vpop.permute.xlu1 %992 }
 0x708   :  { %998 = vst.msk [vmem:[#allocation2 + $0x8] sm:$0xff] %vm996_vm4, %v993_v46  ;;  %v3734_v46 = vld [vmem:[%s4973_s23 + $0x10] sm:$0xff]  }
 0x70b   :  { %v1208_v50 = vpop.permute.xlu1 %1207 }
 0x70c   :  { %1213 = vst.msk [vmem:[#allocation2 + $0x8] sm:$0xff] %vm1211_vm5, %v1208_v50  ;;  %v3735_v50 = vld [vmem:[%s4973_s23 + $0x8] sm:$0xff]  }
 0x70d   :  { %v3782_v51 = vpop.eup %3781 }
 0x70e   :  { %v1324_v52 = vsel %vm676_vm3, %v3782_v51, 0.0 }
 0x70f   :  { %v3784_v53 = vpop.eup %3783  ;;  %1325 = vadd.xlane.f32.xlu0 %v1324_v52  ;;  %v3265_v52 = vld [vmem:[#allocation14] ss:$0 sm:$0xff] }
 0x710   :  { %v1321_v54 = vsel %vm676_vm3, %v3784_v53, 0.0 }
 0x713   :  { %1322 = vadd.xlane.f32.xlu0 %v1321_v54 }
 0x729   :  { %1333 = vrot.lane.b32.xlu0 %v4592_v48, %s4324_s14 }
 0x72d   :  { %1205 = vrot.lane.b32.xlu0 %v1194_v27, %s4326_s18 }
 0x798   :  { %v1326_v55 = vpop.xlane.xlu0 %1325 }
 0x799   :  { %3785 = vrcp.f32 %v1326_v55 }
 0x79c   :  { %v1323_v56 = vpop.xlane.xlu0 %1322 }
 0x79d   :  { %3787 = vrcp.f32 %v1323_v56 }
 0x7a0   :  { %v1334_v57 = vpop.permute.xlu0 %1333 }
 0x7a1   :  { %3511 = vmatprep.subr.mxu1 %v1334_v57 }
 0x7a2   :  { %3512 = vmatpush3.msra.mxu1 %v1334_v57 }
 0x7a3   :  { %3513 = vmatprep.subr.mxu1 %v1332_v45 }
 0x7a4   :  { %3514 = vmatpush3.msra.mxu1 %v1332_v45  ;;  %v1206_v58 = vpop.permute.xlu0 %1205 }
 0x7a5   :  { %1212 = vst.msk [vmem:[#allocation2] sm:$0xff] %vm1211_vm5, %v1206_v58  ;;  %3526 = vmatprep.subr.bf16.mxu1 %v4320_v16 }
 0x7a6   :  { %v3786_v60 = vpop.eup %3785 }
 0x7a7   :  { %v1330_v48 = vmul.f32 %v3786_v60, %v3782_v51  ;;  %v3736_v51 = vld [vmem:[%s4973_s23] sm:$0xff]  }
 0x7aa   :  { %v3788_v61 = vpop.eup %3787 }
 0x7ab   :  { %v1329_v63 = vmul.f32 %v3788_v61, %v3784_v53 }
 0x7ad   :  { %3515 = vmatprep.mubr.msk.f32.mxu1 %vm676_vm3, %v1329_v63 }
 0x7ae   :  { %3516 = vmatmul.mubr.msk.f32.vlgmr.msra.gmra.mxu1 %vm676_vm3, %v1330_v48 }
 0x7af   :  { %3530 = vmatprep.mubr.msk.bf16.mxu1 %vm4321_vm1, %v4320_v16  ;;  %3527 = vmatpush3.bf16.msra.mxu1 %v3731_v24 }
 0x7b0   :  { %3528 = vmatprep.subr.bf16.mxu1 %v4320_v16 }
 0x7b3   :  { %3529 = vmatpush3.bf16.msra.mxu1 %v3732_v25 }
 0x7b4   :  { %3546 = vmatprep.subr.bf16.mxu1 %v4320_v16 }
 0x86e   :  { %v3517_v4 = vpop.f32.mrf.mxu1 }
 0x86f   :  { %1422 = vrot.lane.b32.xlu1 %v3517_v4, %s4327_s22 }
 0x870   :  { %v1409_v5 = vpop.f32.mrf.mxu1 }
 0x871   :  { %1420 = vrot.lane.b32.xlu0 %v1409_v5, %s4327_s22 }
 0x8e1   :  { %v1423_v6 = vpop.permute.xlu1 %1422 }
 0x8e2   :  { %1428 = vst.msk [vmem:[#allocation2 + $0x8] sm:$0xff] %vm1426_vm6, %v1423_v6 }
 0x8e3   :  { %v1421_v39 = vpop.permute.xlu0 %1420 }
 0x8e4   :  { %1427 = vst.msk [vmem:[#allocation2] sm:$0xff] %vm1426_vm6, %v1421_v39 }
 0x8e9   :  { %v1430_v42 = vld [vmem:[#allocation2 + $0x8] sm:$0xff] }
 0x8eb   :  { %v1429_v7 = vld [vmem:[#allocation2] sm:$0xff] }
 0x8ec   :  { %v1431_v38 = vpack.c.bf16 %v1430_v42, %v1429_v7 }
 0x8ee   :  { %3523 = vmatmul.mubr.msk.bf16.vlgmr.msra.gmra.mxu0 %vm365_vm0, %v1431_v38 }
 0x8ef   :  { %3542 = vmatprep.mubr.msk.bf16.mxu0 %vm4321_vm1, %v4320_v16  ;;  %3535 = vmatpush3.bf16.msra.mxu0 %v3733_v49 }
 0x8f0   :  { %3536 = vmatprep.subr.bf16.mxu0 %v4320_v16 }
 0x8f3   :  { %3537 = vmatpush3.bf16.msra.mxu0 %v3734_v46 }
 0x8f4   :  { %3538 = vmatprep.subr.bf16.mxu0 %v4320_v16 }
 0x8f7   :  { %3539 = vmatpush3.bf16.msra.mxu0 %v3735_v50  ;;  %v3275_v50 = vld [vmem:[#allocation17] ss:$0 sm:$0xff] }
 0x8f8   :  { %3540 = vmatprep.subr.bf16.mxu0 %v4320_v16 }
 0x8fb   :  { %3541 = vmatpush3.bf16.msra.mxu0 %v3736_v51 }
 0x8fc   :  { %3562 = vmatprep.subr.bf16.mxu0 %v4320_v16 }
 0x9ae   :  { %v1485_v43 = vpop.f32.mrf.mxu0 }
 0x9af   :  { %v4708_v8 = vadd.f32 %v1485_v43, %v4528_v0 }
 0x9b0   :  { %v3524_v9 = vpop.f32.mrf.mxu0 }
 0x9b1   :  { %v1496_v10 = vsel %vm365_vm0, %v4708_v8, 0.0 }
 0x9b2   :  { %1497 = vadd.xlane.f32.xlu0 %v1496_v10  ;;  %v1488_v11 = vpop.f32.mrf.mxu0 }
 0x9b3   :  { %v4713_v12 = vadd.f32 %v1488_v11, %v4531_v1 }
 0x9b4   :  { %v3525_v13 = vpop.f32.mrf.mxu0 }
 0x9b5   :  { %v1499_v14 = vsel %vm365_vm0, %v4713_v12, 0.0 }
 0x9b6   :  { %1500 = vadd.xlane.f32.xlu1 %v1499_v14 }
 0xa3b   :  { %v1498_v15 = vpop.xlane.xlu0 %1497 }
 0xa3c   :  { %v1502_v17 = vmul.f32 0.03125, %v1498_v15 }
 0xa3e   :  { %v1504_v18 = vsub.f32 %v4708_v8, %v1502_v17  ;;  %v3274_v17 = vld [vmem:[#allocation15] ss:$0 sm:$0xff] }
 0xa3f   :  { %v1501_v0 = vpop.xlane.xlu1 %1500 }
 0xa40   :  { %v1503_v19 = vmul.f32 0.03125, %v1501_v0  ;;  %v1506_v20 = vmul.f32 %v1504_v18, %v1504_v18 }
 0xa42   :  { %v1505_v21 = vsub.f32 %v4713_v12, %v1503_v19  ;;  %v1508_v22 = vsel %vm365_vm0, %v1506_v20, 0.0 }
 0xa43   :  { %1509 = vadd.xlane.f32.xlu0 %v1508_v22 }
 0xa44   :  { %v1507_v23 = vmul.f32 %v1505_v21, %v1505_v21 }
 0xa46   :  { %v1511_v1 = vsel %vm365_vm0, %v1507_v23, 0.0 }
 0xa47   :  { %1512 = vadd.xlane.f32.xlu0 %v1511_v1 }
 0xacc   :  { %v1510_v26 = vpop.xlane.xlu0 %1509 }
 0xacd   :  { %v1514_v27 = vmul.f32 0.03125, %v1510_v26 }
 0xacf   :  { %v1516_v28 = vadd.f32 1e-05, %v1514_v27 }
 0xad0   :  { %v1513_v29 = vpop.xlane.xlu0 %1512 }
 0xad1   :  { %3789 = vrsqrt.f32 %v1516_v28  ;;  %v1515_v30 = vmul.f32 0.03125, %v1513_v29 }
 0xad3   :  { %v1517_v31 = vadd.f32 1e-05, %v1515_v30 }
 0xad5   :  { %3791 = vrsqrt.f32 %v1517_v31 }
 0xade   :  { %v3790_v32 = vpop.eup %3789 }
 0xadf   :  { %v1520_v33 = vmul.f32 %v3790_v32, %v1504_v18 }
 0xae1   :  { %v1528_v37 = vmul.f32 %v3263_v34, %v1520_v33  ;;  %v3737_v33 = vld [vmem:[#allocation20 + $0x8] sm:$0xff]  }
 0xae2   :  { %v3792_v35 = vpop.eup %3791 }
 0xae3   :  { %v1521_v36 = vmul.f32 %v3792_v35, %v1505_v21  ;;  %v1536_v44 = vadd.f32 %v3264_v40, %v1528_v37  ;;  %v3739_v35 = vld [vmem:[#allocation20] sm:$0xff]  }
 0xae5   :  { %v1529_v41 = vmul.f32 %v3263_v34, %v1521_v36  ;;  %v3738_v34 = vld [vmem:[%s4974_s24 + $0x8] sm:$0xff]   ;;  %v3740_v36 = vld [vmem:[%s4974_s24] sm:$0xff]  }
 0xae7   :  { %v1537_v45 = vadd.f32 %v3264_v40, %v1529_v41 }
 0xae9   :  { %v1538_v47 = vpack.c.bf16 %v1537_v45, %v1536_v44 }
 0xaeb   :  { %3531 = vmatmul.mubr.msk.bf16.vlgmr.msra.gmra.mxu1 %vm365_vm0, %v1538_v47 }
 0xaec   :  { %3550 = vmatprep.mubr.msk.bf16.mxu1 %vm4321_vm1, %v4320_v16  ;;  %3547 = vmatpush3.bf16.msra.mxu1 %v3737_v33 }
 0xaed   :  { %3548 = vmatprep.subr.bf16.mxu1 %v4320_v16 }
 0xaf0   :  { %3549 = vmatpush3.bf16.msra.mxu1 %v3739_v35 }
 0xaf1   :  { %3554 = vmatprep.subr.bf16.mxu1 %v4320_v16 }
 0xbab   :  { %v1599_v53 = vpop.f32.mrf.mxu1 }
 0xbac   :  { %v1600_v54 = vadd.f32 %v3265_v52, %v1599_v53 }
 0xbad   :  { %v3532_v55 = vpop.f32.mrf.mxu1 }
 0xbae   :  { %v1606_v56 = vmul.f32 %v1600_v54, %v1600_v54 }
 0xbaf   :  { %v1602_v57 = vpop.f32.mrf.mxu1 }
 0xbb0   :  { %v1608_v58 = vmul.f32 %v1606_v56, %v1600_v54  ;;  %v1603_v60 = vadd.f32 %v3265_v52, %v1602_v57 }
 0xbb1   :  { %v3533_v61 = vpop.f32.mrf.mxu1 }
 0xbb2   :  { %v1610_v63 = vmul.f32 0.044715, %v1608_v58  ;;  %v1607_v48 = vmul.f32 %v1603_v60, %v1603_v60  ;;  %v3741_v58 = vld [vmem:[#allocation21 + $0x8] sm:$0xff]   ;;  %v3742_v61 = vld [vmem:[#allocation21] sm:$0xff]  }
 0xbb4   :  { %v1612_v2 = vadd.f32 %v1610_v63, %v1600_v54  ;;  %v1609_v3 = vmul.f32 %v1607_v48, %v1603_v60 }
 0xbb6   :  { %v1614_v4 = vmul.f32 0.7978846, %v1612_v2  ;;  %v1611_v5 = vmul.f32 0.044715, %v1609_v3 }
 0xbb8   :  { %3793 = vtanh.f32 %v1614_v4  ;;  %v1613_v6 = vadd.f32 %v1611_v5, %v1603_v60 }
 0xbba   :  { %v1615_v39 = vmul.f32 0.7978846, %v1613_v6 }
 0xbbc   :  { %3795 = vtanh.f32 %v1615_v39 }
 0xbc5   :  { %v3794_v7 = vpop.eup %3793 }
 0xbc6   :  { %v1618_v42 = vadd.f32 1.0, %v3794_v7 }
 0xbc8   :  { %v1620_v43 = vmul.f32 0.5, %v1618_v42 }
 0xbc9   :  { %v3796_v38 = vpop.eup %3795 }
 0xbca   :  { %v1619_v9 = vadd.f32 1.0, %v3796_v38  ;;  %v1622_v11 = vmul.f32 %v1620_v43, %v1600_v54  ;;  %v3276_v54 = vld [vmem:[#allocation18] ss:$0 sm:$0xff] }
 0xbcc   :  { %v1621_v10 = vmul.f32 0.5, %v1619_v9 }
 0xbce   :  { %v1623_v13 = vmul.f32 %v1621_v10, %v1603_v60 }
 0xbd0   :  { %v1624_v14 = vpack.c.bf16 %v1623_v13, %v1622_v11 }
 0xbd2   :  { %3543 = vmatmul.mubr.msk.bf16.vlgmr.msra.gmra.mxu0 %vm1657_vm7, %v1624_v14 }
 0xbd3   :  { %3566 = vmatprep.mubr.msk.bf16.mxu0 %vm4321_vm1, %v4320_v16  ;;  %3563 = vmatpush3.bf16.msra.mxu0 %v3738_v34 }
 0xbd4   :  { %3564 = vmatprep.subr.bf16.mxu0 %v4320_v16 }
 0xbd7   :  { %3565 = vmatpush3.bf16.msra.mxu0 %v3740_v36 }
 0xc92   :  { %v1695_v15 = vpop.f32.mrf.mxu0 }
 0xc93   :  { %v1702_v18 = vadd.f32 %v1695_v15, %v4708_v8 }
 0xc94   :  { %v3544_v0 = vpop.f32.mrf.mxu0 }
 0xc95   :  { %v4738_v19 = vadd.f32 %v3274_v17, %v1702_v18 }
 0xc96   :  { %v1698_v20 = vpop.f32.mrf.mxu0 }
 0xc97   :  { %v1703_v21 = vadd.f32 %v1698_v20, %v4713_v12  ;;  %v1715_v22 = vsel %vm365_vm0, %v4738_v19, 0.0 }
 0xc98   :  { %1716 = vadd.xlane.f32.xlu0 %v1715_v22  ;;  %v3545_v23 = vpop.f32.mrf.mxu0 }
 0xc99   :  { %v4743_v1 = vadd.f32 %v3274_v17, %v1703_v21 }
 0xc9b   :  { %v1718_v24 = vsel %vm365_vm0, %v4743_v1, 0.0 }
 0xc9c   :  { %1719 = vadd.xlane.f32.xlu1 %v1718_v24 }
 0xd21   :  { %v1717_v25 = vpop.xlane.xlu0 %1716 }
 0xd22   :  { %v1721_v8 = vmul.f32 0.03125, %v1717_v25 }
 0xd24   :  { %v1723_v26 = vsub.f32 %v4738_v19, %v1721_v8 }
 0xd25   :  { %v1720_v27 = vpop.xlane.xlu1 %1719 }
 0xd26   :  { %v1722_v28 = vmul.f32 0.03125, %v1720_v27  ;;  %v1725_v12 = vmul.f32 %v1723_v26, %v1723_v26 }
 0xd28   :  { %v1724_v29 = vsub.f32 %v4743_v1, %v1722_v28  ;;  %v1727_v30 = vsel %vm365_vm0, %v1725_v12, 0.0 }
 0xd29   :  { %1728 = vadd.xlane.f32.xlu0 %v1727_v30 }
 0xd2a   :  { %v1726_v31 = vmul.f32 %v1724_v29, %v1724_v29 }
 0xd2c   :  { %v1730_v32 = vsel %vm365_vm0, %v1726_v31, 0.0 }
 0xd2d   :  { %1731 = vadd.xlane.f32.xlu1 %v1730_v32 }
 0xdb2   :  { %v1729_v37 = vpop.xlane.xlu0 %1728 }
 0xdb3   :  { %v1733_v40 = vmul.f32 0.03125, %v1729_v37 }
 0xdb5   :  { %v1735_v41 = vadd.f32 1e-05, %v1733_v40 }
 0xdb6   :  { %v1732_v44 = vpop.xlane.xlu1 %1731 }
 0xdb7   :  { %3797 = vrsqrt.f32 %v1735_v41  ;;  %v1734_v45 = vmul.f32 0.03125, %v1732_v44 }
 0xdb9   :  { %v1736_v47 = vadd.f32 1e-05, %v1734_v45 }
 0xdbb   :  { %3799 = vrsqrt.f32 %v1736_v47 }
 0xdc4   :  { %v3798_v49 = vpop.eup %3797 }
 0xdc5   :  { %v1739_v46 = vmul.f32 %v3798_v49, %v1723_v26 }
 0xdc7   :  { %v1747_v53 = vmul.f32 %v3275_v50, %v1739_v46 }
 0xdc8   :  { %v3800_v51 = vpop.eup %3799 }
 0xdc9   :  { %v1740_v52 = vmul.f32 %v3800_v51, %v1724_v29  ;;  %v1755_v56 = vadd.f32 %v3276_v54, %v1747_v53 }
 0xdcb   :  { %v1748_v55 = vmul.f32 %v3275_v50, %v1740_v52 }
 0xdcd   :  { %v1756_v57 = vadd.f32 %v3276_v54, %v1748_v55 }
 0xdcf   :  { %v1757_v60 = vpack.c.bf16 %v1756_v57, %v1755_v56 }
 0xdd1   :  { %3551 = vmatmul.mubr.msk.bf16.vlgmr.msra.gmra.mxu1 %vm365_vm0, %v1757_v60  ;;  %3567 = vmatmul.mubr.msk.bf16.vlgmr.msra.gmra.mxu0 %vm365_vm0, %v1757_v60 }
 0xdd2   :  { %3555 = vmatpush3.bf16.msra.mxu1 %v3741_v58  ;;  %3558 = vmatprep.mubr.msk.bf16.mxu1 %vm4321_vm1, %v4320_v16 }
 0xdd3   :  { %3556 = vmatprep.subr.bf16.mxu1 %v4320_v16 }
 0xdd6   :  { %3557 = vmatpush3.bf16.msra.mxu1 %v3742_v61 }
 0xdd9   :  { %3559 = vmatmul.mubr.msk.bf16.vlgmr.msra.gmra.mxu1 %vm365_vm0, %v1757_v60 }
 0xe91   :  { %v4762_v63 = vpop.f32.mrf.mxu1  ;;  %v4764_v48 = vpop.f32.mrf.mxu0 }
 0xe92   :  { %3574 = vmatprep.mubr.msk.f32.mxu1 %vm584_vm2, %v4762_v63 }
 0xe93   :  { %v3552_v2 = vpop.f32.mrf.mxu1  ;;  %v3568_v3 = vpop.f32.mrf.mxu0 }
 0xe95   :  { %v4768_v4 = vpop.f32.mrf.mxu1  ;;  %v4770_v5 = vpop.f32.mrf.mxu0 }
 0xe97   :  { %v3553_v6 = vpop.f32.mrf.mxu1  ;;  %v3569_v39 = vpop.f32.mrf.mxu0 }
 0xe99   :  { %v4772_v7 = vpop.f32.mrf.mxu1 }
 0xe9a   :  { %2132 = vrot.lane.b32.xlu1 %v4772_v7, %s4322_s8 }
 0xe9b   :  { %v3560_v42 = vpop.f32.mrf.mxu1 }
 0xe9d   :  { %v4776_v38 = vpop.f32.mrf.mxu1 }
 0xe9e   :  { %2128 = vrot.lane.b32.xlu1 %v4762_v63, %s4322_s8  ;;  %2134 = vrot.lane.b32.xlu0 %v4776_v38, %s4322_s8 }
 0xe9f   :  { %3570 = vmatprep.subr.msk.mxu1 %vm584_vm2, %v4776_v38  ;;  %v3561_v43 = vpop.f32.mrf.mxu1 }
 0xea0   :  { %3571 = vmatpush3.xpose.msk.msra.mxu1 %vm584_vm2, %v4776_v38 }
 0xea1   :  { %3572 = vmatprep.subr.msk.mxu1 %vm584_vm2, %v4772_v7 }
 0xea2   :  { %2350 = vrot.lane.b32.xlu1 %v4776_v38, %s4323_s3  ;;  %2130 = vrot.lane.b32.xlu0 %v4768_v4, %s4322_s8 }
 0xea4   :  { %3573 = vmatpush3.xpose.msk.msra.mxu1 %vm584_vm2, %v4772_v7 }
 0xea5   :  { %3577 = vmatprep.subr.mxu1 %v4770_v5 }
 0xea6   :  { %2348 = vrot.lane.b32.xlu1 %v4772_v7, %s4323_s3  ;;  %2344 = vrot.lane.b32.xlu0 %v4762_v63, %s4323_s3 }
 0xea7   :  { %3575 = vmatmul.mubr.msk.f32.vlgmr.msra.gmra.mxu1 %vm584_vm2, %v4768_v4 }
 0xea8   :  { %3578 = vmatpush3.msra.mxu1 %v4770_v5 }
 0xea9   :  { %3579 = vmatprep.subr.mxu1 %v4764_v48 }
 0xeaa   :  { %3580 = vmatpush3.msra.mxu1 %v4764_v48  ;;  %2346 = vrot.lane.b32.xlu1 %v4768_v4, %s4323_s3 }
 0xf0c   :  { %v2133_v9 = vpop.permute.xlu1 %2132 }
 0xf10   :  { %v2129_v10 = vpop.permute.xlu1 %2128  ;;  %v2135_v11 = vpop.permute.xlu0 %2134 }
 0xf11   :  { %3584 = vmatprep.subr.msk.mxu0 %vm584_vm2, %v2135_v11  ;;  %3588 = vmatprep.mubr.msk.f32.mxu0 %vm584_vm2, %v2129_v10 }
 0xf12   :  { %3585 = vmatpush3.xpose.msk.msra.mxu0 %vm584_vm2, %v2135_v11 }
 0xf13   :  { %3586 = vmatprep.subr.msk.mxu0 %vm584_vm2, %v2133_v9 }
 0xf14   :  { %v2351_v13 = vpop.permute.xlu1 %2350  ;;  %v2131_v14 = vpop.permute.xlu0 %2130 }
 0xf16   :  { %3587 = vmatpush3.xpose.msk.msra.mxu0 %vm584_vm2, %v2133_v9 }
 0xf17   :  { %3598 = vmatprep.subr.msk.mxu0 %vm584_vm2, %v2351_v13 }
 0xf18   :  { %v2345_v15 = vpop.permute.xlu0 %2344  ;;  %v2349_v17 = vpop.permute.xlu1 %2348 }
 0xf19   :  { %3589 = vmatmul.mubr.msk.f32.vlgmr.msra.gmra.mxu0 %vm584_vm2, %v2131_v14 }
 0xf1a   :  { %3599 = vmatpush3.xpose.msk.msra.mxu0 %vm584_vm2, %v2351_v13  ;;  %3602 = vmatprep.mubr.msk.f32.mxu0 %vm584_vm2, %v2345_v15 }
 0xf1b   :  { %3600 = vmatprep.subr.msk.mxu0 %vm584_vm2, %v2349_v17 }
 0xf1c   :  { %v2347_v18 = vpop.permute.xlu1 %2346 }
 0xf1e   :  { %3601 = vmatpush3.xpose.msk.msra.mxu0 %vm584_vm2, %v2349_v17 }
 0xf21   :  { %3603 = vmatmul.mubr.msk.f32.vlgmr.msra.gmra.mxu0 %vm584_vm2, %v2347_v18 }
 0xf67   :  { %v3576_v0 = vpop.f32.mrf.mxu1 }
 0xf68   :  { %v2020_v20 = vmul.f32 0.35355338, %v3576_v0 }
 0xf69   :  { %v2010_v21 = vpop.f32.mrf.mxu1 }
 0xf6a   :  { %v2019_v22 = vmul.f32 0.35355338, %v2010_v21  ;;  %v2022_v23 = vadd.f32 %v2020_v20, %v4622_v59 }
 0xf6c   :  { %v2026_v24 = vsel %vm676_vm3, %v2022_v23, -inf  ;;  %v2021_v25 = vadd.f32 %v2019_v22, %v4625_v62 }
 0xf6d   :  { %2027 = vmax.xlane.f32.xlu1 %v2026_v24 }
 0xf6e   :  { %v2023_v8 = vsel %vm676_vm3, %v2021_v25, -inf }
 0xf6f   :  { %2024 = vmax.xlane.f32.xlu0 %v2023_v8 }
 0xfd9   :  { %v3590_v26 = vpop.f32.mrf.mxu0 }
 0xfda   :  { %v2220_v27 = vmul.f32 0.35355338, %v3590_v26 }
 0xfdb   :  { %v2210_v28 = vpop.f32.mrf.mxu0 }
 0xfdc   :  { %v2219_v12 = vmul.f32 0.35355338, %v2210_v28  ;;  %v2222_v29 = vadd.f32 %v2220_v27, %v4622_v59 }
 0xfde   :  { %v2226_v30 = vsel %vm676_vm3, %v2222_v29, -inf  ;;  %v2221_v31 = vadd.f32 %v2219_v12, %v4625_v62 }
 0xfdf   :  { %2227 = vmax.xlane.f32.xlu0 %v2226_v30 }
 0xfe0   :  { %v2223_v34 = vsel %vm676_vm3, %v2221_v31, -inf }
 0xfe1   :  { %v3604_v32 = vpop.f32.mrf.mxu0 }
 0xfe2   :  { %v2436_v33 = vmul.f32 0.35355338, %v3604_v32 }
 0xfe3   :  { %v2426_v35 = vpop.f32.mrf.mxu0  ;;  %2224 = vmax.xlane.f32.xlu0 %v2223_v34 }
 0xfe4   :  { %v2435_v36 = vmul.f32 0.35355338, %v2426_v35  ;;  %v2438_v37 = vadd.f32 %v2436_v33, %v4622_v59 }
 0xfe6   :  { %v2442_v40 = vsel %vm676_vm3, %v2438_v37, -inf  ;;  %v2437_v41 = vadd.f32 %v2435_v36, %v4625_v62 }
 0xfe7   :  { %2443 = vmax.xlane.f32.xlu1 %v2442_v40 }
 0xfe8   :  { %v2439_v44 = vsel %vm676_vm3, %v2437_v41, -inf }
 0xfe9   :  { %2440 = vmax.xlane.f32.xlu0 %v2439_v44 }
 0xff6   :  { %v2028_v47 = vpop.xlane.xlu1 %2027 }
 0xff7   :  { %v2030_v49 = vsub.f32 %v2022_v23, %v2028_v47 }
 0xff8   :  { %2247 = vrot.lane.b32.xlu1 %v4764_v48, %s4322_s8  ;;  %v2025_v59 = vpop.xlane.xlu0 %2024 }
 0xff9   :  { %v2029_v45 = vsub.f32 %v2021_v25, %v2025_v59  ;;  %v2033_v46 = vmul.f32 1.442695, %v2030_v49 }
 0xffb   :  { %v2031_v62 = vmul.f32 1.442695, %v2029_v45 }
 0xffc   :  { %2463 = vrot.lane.b32.xlu1 %v4770_v5, %s4323_s3 }
 0xffd   :  { %3801 = vpow2.f32 %v2031_v62 }
 0xffe   :  { %3803 = vpow2.f32 %v2033_v46 }
 0xfff   :  { %2249 = vrot.lane.b32.xlu0 %v4770_v5, %s4322_s8 }
0x1000   :  { %2461 = vrot.lane.b32.xlu1 %v4764_v48, %s4323_s3 }
0x100a   :  { %v3802_v50 = vpop.eup %3801 }
0x100b   :  { %v2035_v51 = vsel %vm676_vm3, %v3802_v50, 0.0  ;;  %v3804_v52 = vpop.eup %3803 }
0x100c   :  { %v2038_v53 = vsel %vm676_vm3, %v3804_v52, 0.0 }
0x101e   :  { %2036 = vadd.xlane.f32.xlu0 %v2035_v51  ;;  %v3845_v51 = vld [vmem:[%s4972_s4 + $0x8] sm:$0xff] }
0x1024   :  { %2039 = vadd.xlane.f32.xlu1 %v2038_v53 }
0x1068   :  { %v2228_v54 = vpop.xlane.xlu0 %2227 }
0x1069   :  { %v2230_v55 = vsub.f32 %v2222_v29, %v2228_v54  ;;  %v3846_v54 = vld [vmem:[%s4972_s4] sm:$0xff] }
0x106b   :  { %v2233_v56 = vmul.f32 1.442695, %v2230_v55 }
0x106c   :  { %v2225_v57 = vpop.xlane.xlu0 %2224 }
0x106d   :  { %3805 = vpow2.f32 %v2233_v56  ;;  %v2229_v58 = vsub.f32 %v2221_v31, %v2225_v57 }
0x106f   :  { %v2231_v60 = vmul.f32 1.442695, %v2229_v58 }
0x1070   :  { %v2444_v61 = vpop.xlane.xlu1 %2443 }
0x1071   :  { %3807 = vpow2.f32 %v2231_v60  ;;  %v2446_v2 = vsub.f32 %v2438_v37, %v2444_v61 }
0x1072   :  { %v2441_v3 = vpop.xlane.xlu0 %2440 }
0x1073   :  { %v2449_v6 = vmul.f32 1.442695, %v2446_v2  ;;  %v2445_v39 = vsub.f32 %v2437_v41, %v2441_v3 }
0x1074   :  { %v2248_v0 = vpop.permute.xlu1 %2247 }
0x1075   :  { %3809 = vpow2.f32 %v2449_v6  ;;  %v2447_v42 = vmul.f32 1.442695, %v2445_v39 }
0x1076   :  { %v2250_v43 = vpop.permute.xlu0 %2249 }
0x1077   :  { %3811 = vpow2.f32 %v2447_v42  ;;  %3591 = vmatprep.subr.mxu1 %v2250_v43 }
0x1078   :  { %v2464_v20 = vpop.permute.xlu1 %2463 }
0x107a   :  { %v3806_v9 = vpop.eup %3805 }
0x107b   :  { %v2238_v10 = vsel %vm676_vm3, %v3806_v9, 0.0 }
0x107c   :  { %2239 = vadd.xlane.f32.xlu1 %v2238_v10  ;;  %v2462_v22 = vpop.permute.xlu1 %2461 }
0x107e   :  { %v3808_v11 = vpop.eup %3807 }
0x107f   :  { %v2235_v13 = vsel %vm676_vm3, %v3808_v11, 0.0 }
0x1080   :  { %2236 = vadd.xlane.f32.xlu0 %v2235_v13 }
0x1082   :  { %v3810_v14 = vpop.eup %3809 }
0x1083   :  { %v2454_v15 = vsel %vm676_vm3, %v3810_v14, 0.0 }
0x1084   :  { %v3812_v17 = vpop.eup %3811  ;;  %2455 = vadd.xlane.f32.xlu1 %v2454_v15 }
0x1085   :  { %v2451_v18 = vsel %vm676_vm3, %v3812_v17, 0.0 }
0x1086   :  { %2452 = vadd.xlane.f32.xlu0 %v2451_v18 }
0x1095   :  { %2562 = vrot.lane.b32.xlu1 %v4772_v7, %s4324_s14 }
0x1099   :  { %2560 = vrot.lane.b32.xlu1 %v4768_v4, %s4324_s14 }
0x109c   :  { %2564 = vrot.lane.b32.xlu0 %v4776_v38, %s4324_s14 }
0x10a0   :  { %2558 = vrot.lane.b32.xlu0 %v4762_v63, %s4324_s14 }
0x10a7   :  { %v2037_v21 = vpop.xlane.xlu0 %2036 }
0x10a8   :  { %3813 = vrcp.f32 %v2037_v21  ;;  %v3743_v21 = vld [vmem:[#allocation23 + $0x8] sm:$0xff]  }
0x10ad   :  { %v2040_v23 = vpop.xlane.xlu1 %2039 }
0x10ae   :  { %3815 = vrcp.f32 %v2040_v23 }
0x10b5   :  { %v3814_v24 = vpop.eup %3813 }
0x10b6   :  { %v2043_v25 = vmul.f32 %v3814_v24, %v3802_v50 }
0x10b8   :  { %3581 = vmatprep.mubr.msk.f32.mxu1 %vm676_vm3, %v2043_v25 }
0x10bb   :  { %v3816_v7 = vpop.eup %3815 }
0x10bc   :  { %v2044_v8 = vmul.f32 %v3816_v7, %v3804_v52 }
0x10be   :  { %3582 = vmatmul.mubr.msk.f32.vlgmr.msra.gmra.mxu1 %vm676_vm3, %v2044_v8 }
0x10bf   :  { %3592 = vmatpush3.msra.mxu1 %v2250_v43 }
0x10c0   :  { %3593 = vmatprep.subr.mxu1 %v2248_v0 }
0x10c1   :  { %3594 = vmatpush3.msra.mxu1 %v2248_v0 }
0x10c2   :  { %3605 = vmatprep.subr.mxu1 %v2464_v20 }
0x1105   :  { %v2240_v4 = vpop.xlane.xlu1 %2239 }
0x1106   :  { %3817 = vrcp.f32 %v2240_v4 }
0x1109   :  { %v2237_v63 = vpop.xlane.xlu0 %2236 }
0x110a   :  { %3819 = vrcp.f32 %v2237_v63 }
0x110d   :  { %v2456_v38 = vpop.xlane.xlu1 %2455 }
0x110e   :  { %3821 = vrcp.f32 %v2456_v38 }
0x110f   :  { %v2453_v26 = vpop.xlane.xlu0 %2452 }
0x1110   :  { %3823 = vrcp.f32 %v2453_v26 }
0x1111   :  { %v2563_v36 = vpop.permute.xlu1 %2562 }
0x1113   :  { %v3818_v27 = vpop.eup %3817  ;;  %v2565_v30 = vpop.permute.xlu0 %2564 }
0x1114   :  { %v2244_v29 = vmul.f32 %v3818_v27, %v3806_v9 }
0x1115   :  { %v2561_v37 = vpop.permute.xlu1 %2560 }
0x1117   :  { %v3820_v28 = vpop.eup %3819  ;;  %v2559_v35 = vpop.permute.xlu0 %2558 }
0x1118   :  { %v2243_v12 = vmul.f32 %v3820_v28, %v3808_v11 }
0x111a   :  { %3595 = vmatprep.mubr.msk.f32.mxu1 %vm676_vm3, %v2243_v12 }
0x111b   :  { %3596 = vmatmul.mubr.msk.f32.vlgmr.msra.gmra.mxu1 %vm676_vm3, %v2244_v29  ;;  %v3822_v31 = vpop.eup %3821 }
0x111c   :  { %3606 = vmatpush3.msra.mxu1 %v2464_v20  ;;  %v2460_v34 = vmul.f32 %v3822_v31, %v3810_v14 }
0x111d   :  { %v3824_v32 = vpop.eup %3823  ;;  %3607 = vmatprep.subr.mxu1 %v2462_v22 }
0x111e   :  { %3608 = vmatpush3.msra.mxu1 %v2462_v22  ;;  %v2459_v33 = vmul.f32 %v3824_v32, %v3812_v17  ;;  %v3744_v22 = vld [vmem:[#allocation23] sm:$0xff]  }
0x111f   :  { %3612 = vmatprep.subr.msk.mxu1 %vm584_vm2, %v2565_v30 }
0x1120   :  { %3609 = vmatprep.mubr.msk.f32.mxu1 %vm676_vm3, %v2459_v33 }
0x1121   :  { %3610 = vmatmul.mubr.msk.f32.vlgmr.msra.gmra.mxu1 %vm676_vm3, %v2460_v34 }
0x1122   :  { %3613 = vmatpush3.xpose.msk.msra.mxu1 %vm584_vm2, %v2565_v30  ;;  %3616 = vmatprep.mubr.msk.f32.mxu1 %vm584_vm2, %v2559_v35 }
0x1123   :  { %3614 = vmatprep.subr.msk.mxu1 %vm584_vm2, %v2563_v36 }
0x1126   :  { %3615 = vmatpush3.xpose.msk.msra.mxu1 %vm584_vm2, %v2563_v36 }
0x1127   :  { %3634 = vmatprep.subr.bf16.mxu1 %v4320_v16 }
0x1129   :  { %3617 = vmatmul.mubr.msk.f32.vlgmr.msra.gmra.mxu1 %vm584_vm2, %v2561_v37 }
0x112a   :  { %3638 = vmatprep.mubr.msk.bf16.mxu1 %vm4321_vm1, %v4320_v16 }
0x117e   :  { %v3583_v40 = vpop.f32.mrf.mxu1 }
0x117f   :  { %2127 = vst.msk [vmem:[#allocation2 + $0x8] sm:$0xff] %vm584_vm2, %v3583_v40 }
0x1180   :  { %v2117_v41 = vpop.f32.mrf.mxu1 }
0x1181   :  { %2126 = vst.msk [vmem:[#allocation2] sm:$0xff] %vm584_vm2, %v2117_v41 }
0x11db   :  { %v3597_v44 = vpop.f32.mrf.mxu1 }
0x11dd   :  { %v2325_v59 = vpop.f32.mrf.mxu1 }
0x11e1   :  { %v3611_v45 = vpop.f32.mrf.mxu1 }
0x11e3   :  { %v2539_v47 = vpop.f32.mrf.mxu1 }
0x11e9   :  { %v3618_v62 = vpop.f32.mrf.mxu1 }
0x11ea   :  { %v2650_v49 = vmul.f32 0.35355338, %v3618_v62 }
0x11eb   :  { %v2640_v46 = vpop.f32.mrf.mxu1 }
0x11ec   :  { %v2649_v50 = vmul.f32 0.35355338, %v2640_v46  ;;  %v2652_v52 = vadd.f32 %v3845_v51, %v2650_v49 }
0x11ee   :  { %v2656_v53 = vsel %vm676_vm3, %v2652_v52, -inf  ;;  %v2651_v55 = vadd.f32 %v3846_v54, %v2649_v50 }
0x11ef   :  { %2657 = vmax.xlane.f32.xlu1 %v2656_v53  ;;  %v3313_v53 = vld [vmem:[%s4975_s0] ss:$0 sm:$0xff] }
0x11f0   :  { %v2653_v56 = vsel %vm676_vm3, %v2651_v55, -inf }
0x11f1   :  { %2654 = vmax.xlane.f32.xlu0 %v2653_v56 }
0x1200   :  { %2675 = vrot.lane.b32.xlu1 %v4764_v48, %s4324_s14 }
0x1204   :  { %2336 = vrot.lane.b32.xlu1 %v2325_v59, %s4325_s16  ;;  %v3746_v59 = vld [vmem:[#allocation26] sm:$0xff]  }
0x1208   :  { %2338 = vrot.lane.b32.xlu1 %v3597_v44, %s4325_s16  ;;  %v3745_v44 = vld [vmem:[#allocation26 + $0x8] sm:$0xff]  }
0x1209   :  { %3635 = vmatpush3.bf16.msra.mxu1 %v3745_v44 }
0x120a   :  { %3636 = vmatprep.subr.bf16.mxu1 %v4320_v16 }
0x120c   :  { %2552 = vrot.lane.b32.xlu1 %v3611_v45, %s4326_s18 }
0x120d   :  { %3637 = vmatpush3.bf16.msra.mxu1 %v3746_v59 }
0x120e   :  { %3654 = vmatprep.subr.bf16.mxu1 %v4320_v16 }
0x1278   :  { %v2658_v57 = vpop.xlane.xlu1 %2657 }
0x1279   :  { %v2660_v58 = vsub.f32 %v2652_v52, %v2658_v57  ;;  %v3314_v57 = vld [vmem:[#allocation24] ss:$0 sm:$0xff] }
0x127a   :  { %v2655_v60 = vpop.xlane.xlu0 %2654 }
0x127b   :  { %v2663_v61 = vmul.f32 1.442695, %v2660_v58  ;;  %v2659_v2 = vsub.f32 %v2651_v55, %v2655_v60 }
0x127c   :  { %v2676_v3 = vpop.permute.xlu1 %2675 }
0x127d   :  { %3825 = vpow2.f32 %v2663_v61  ;;  %v2661_v6 = vmul.f32 1.442695, %v2659_v2 }
0x127f   :  { %3827 = vpow2.f32 %v2661_v6  ;;  %v3748_v6 = vld [vmem:[%s4976_s12 + $0x10] sm:$0xff]  }
0x1280   :  { %v2337_v39 = vpop.permute.xlu1 %2336 }
0x1281   :  { %2342 = vst.msk [vmem:[#allocation2] sm:$0xff] %vm996_vm4, %v2337_v39  ;;  %v3749_v39 = vld [vmem:[%s4976_s12 + $0x8] sm:$0xff]  }
0x1284   :  { %v2339_v42 = vpop.permute.xlu1 %2338 }
0x1285   :  { %2343 = vst.msk [vmem:[#allocation2 + $0x8] sm:$0xff] %vm996_vm4, %v2339_v42  ;;  %v3750_v42 = vld [vmem:[%s4976_s12] sm:$0xff]  }
0x1288   :  { %v2553_v48 = vpop.permute.xlu1 %2552 }
0x1289   :  { %2557 = vst.msk [vmem:[#allocation2 + $0x8] sm:$0xff] %vm1211_vm5, %v2553_v48  ;;  %v3315_v48 = vld [vmem:[#allocation27] ss:$0 sm:$0xff] }
0x128a   :  { %v3826_v43 = vpop.eup %3825 }
0x128b   :  { %v2668_v9 = vsel %vm676_vm3, %v3826_v43, 0.0 }
0x128c   :  { %v3828_v10 = vpop.eup %3827  ;;  %2669 = vadd.xlane.f32.xlu0 %v2668_v9 }
0x128d   :  { %v2665_v11 = vsel %vm676_vm3, %v3828_v10, 0.0 }
0x1290   :  { %2666 = vadd.xlane.f32.xlu0 %v2665_v11 }
0x12a6   :  { %2677 = vrot.lane.b32.xlu0 %v4770_v5, %s4324_s14 }
0x12aa   :  { %2550 = vrot.lane.b32.xlu0 %v2539_v47, %s4326_s18 }
0x1315   :  { %v2670_v13 = vpop.xlane.xlu0 %2669 }
0x1316   :  { %3829 = vrcp.f32 %v2670_v13 }
0x1319   :  { %v2667_v14 = vpop.xlane.xlu0 %2666 }
0x131a   :  { %3831 = vrcp.f32 %v2667_v14 }
0x131d   :  { %v2678_v15 = vpop.permute.xlu0 %2677 }
0x131e   :  { %3619 = vmatprep.subr.mxu0 %v2678_v15 }
0x131f   :  { %3620 = vmatpush3.msra.mxu0 %v2678_v15 }
0x1320   :  { %3621 = vmatprep.subr.mxu0 %v2676_v3 }
0x1321   :  { %3622 = vmatpush3.msra.mxu0 %v2676_v3  ;;  %v2551_v17 = vpop.permute.xlu0 %2550  ;;  %v3747_v3 = vld [vmem:[%s4976_s12 + $0x18] sm:$0xff]  }
0x1322   :  { %2556 = vst.msk [vmem:[#allocation2] sm:$0xff] %vm1211_vm5, %v2551_v17  ;;  %3626 = vmatprep.subr.bf16.mxu0 %v4320_v16 }
0x1323   :  { %v3830_v18 = vpop.eup %3829 }
0x1324   :  { %v2674_v5 = vmul.f32 %v3830_v18, %v3826_v43 }
0x1327   :  { %v3832_v0 = vpop.eup %3831 }
0x1328   :  { %v2673_v20 = vmul.f32 %v3832_v0, %v3828_v10 }
0x132a   :  { %3623 = vmatprep.mubr.msk.f32.mxu0 %vm676_vm3, %v2673_v20 }
0x132b   :  { %3624 = vmatmul.mubr.msk.f32.vlgmr.msra.gmra.mxu0 %vm676_vm3, %v2674_v5 }
0x132c   :  { %3630 = vmatprep.mubr.msk.bf16.mxu0 %vm4321_vm1, %v4320_v16  ;;  %3627 = vmatpush3.bf16.msra.mxu0 %v3743_v21 }
0x132d   :  { %3628 = vmatprep.subr.bf16.mxu0 %v4320_v16 }
0x1330   :  { %3629 = vmatpush3.bf16.msra.mxu0 %v3744_v22 }
0x1331   :  { %3642 = vmatprep.subr.bf16.mxu0 %v4320_v16 }
0x13eb   :  { %v3625_v23 = vpop.f32.mrf.mxu0 }
0x13ec   :  { %2766 = vrot.lane.b32.xlu1 %v3625_v23, %s4327_s22 }
0x13ed   :  { %v2753_v24 = vpop.f32.mrf.mxu0 }
0x13ee   :  { %2764 = vrot.lane.b32.xlu0 %v2753_v24, %s4327_s22 }
0x145e   :  { %v2767_v25 = vpop.permute.xlu1 %2766 }
0x145f   :  { %2771 = vst.msk [vmem:[#allocation2 + $0x8] sm:$0xff] %vm1426_vm6, %v2767_v25 }
0x1460   :  { %v2765_v7 = vpop.permute.xlu0 %2764 }
0x1461   :  { %2770 = vst.msk [vmem:[#allocation2] sm:$0xff] %vm1426_vm6, %v2765_v7 }
0x1466   :  { %v2773_v4 = vld [vmem:[#allocation2 + $0x8] sm:$0xff] }
0x1468   :  { %v2772_v8 = vld [vmem:[#allocation2] sm:$0xff] }
0x1469   :  { %v2774_v63 = vpack.c.bf16 %v2773_v4, %v2772_v8 }
0x146b   :  { %3631 = vmatmul.mubr.msk.bf16.vlgmr.msra.gmra.mxu0 %vm365_vm0, %v2774_v63 }
0x146c   :  { %3650 = vmatprep.mubr.msk.bf16.mxu0 %vm4321_vm1, %v4320_v16  ;;  %3643 = vmatpush3.bf16.msra.mxu0 %v3747_v3 }
0x146d   :  { %3644 = vmatprep.subr.bf16.mxu0 %v4320_v16 }
0x1470   :  { %3645 = vmatpush3.bf16.msra.mxu0 %v3748_v6 }
0x1471   :  { %3646 = vmatprep.subr.bf16.mxu0 %v4320_v16 }
0x1474   :  { %3647 = vmatpush3.bf16.msra.mxu0 %v3749_v39  ;;  %v3326_v39 = vld [vmem:[#allocation32] ss:$0 sm:$0xff] }
0x1475   :  { %3648 = vmatprep.subr.bf16.mxu0 %v4320_v16 }
0x1478   :  { %3649 = vmatpush3.bf16.msra.mxu0 %v3750_v42 }
0x152b   :  { %v2828_v38 = vpop.f32.mrf.mxu0 }
0x152c   :  { %v4902_v26 = vadd.f32 %v2828_v38, %v4738_v19 }
0x152d   :  { %v3632_v27 = vpop.f32.mrf.mxu0 }
0x152e   :  { %v2839_v28 = vsel %vm365_vm0, %v4902_v26, 0.0 }
0x152f   :  { %2840 = vadd.xlane.f32.xlu0 %v2839_v28  ;;  %v2831_v12 = vpop.f32.mrf.mxu0 }
0x1530   :  { %v4907_v29 = vadd.f32 %v2831_v12, %v4743_v1 }
0x1531   :  { %v3633_v30 = vpop.f32.mrf.mxu0 }
0x1532   :  { %v2842_v31 = vsel %vm365_vm0, %v4907_v29, 0.0 }
0x1533   :  { %2843 = vadd.xlane.f32.xlu1 %v2842_v31  ;;  %v3324_v31 = vld [vmem:[#allocation29] ss:$0 sm:$0xff] }
0x15b8   :  { %v2841_v32 = vpop.xlane.xlu0 %2840 }
0x15b9   :  { %v2845_v33 = vmul.f32 0.03125, %v2841_v32 }
0x15bb   :  { %v2847_v34 = vsub.f32 %v4902_v26, %v2845_v33 }
0x15bc   :  { %v2844_v19 = vpop.xlane.xlu1 %2843 }
0x15bd   :  { %v2846_v35 = vmul.f32 0.03125, %v2844_v19  ;;  %v2849_v36 = vmul.f32 %v2847_v34, %v2847_v34 }
0x15bf   :  { %v2848_v37 = vsub.f32 %v4907_v29, %v2846_v35  ;;  %v2851_v40 = vsel %vm365_vm0, %v2849_v36, 0.0 }
0x15c0   :  { %2852 = vadd.xlane.f32.xlu0 %v2851_v40 }
0x15c1   :  { %v2850_v41 = vmul.f32 %v2848_v37, %v2848_v37 }
0x15c3   :  { %v2854_v1 = vsel %vm365_vm0, %v2850_v41, 0.0 }
0x15c4   :  { %2855 = vadd.xlane.f32.xlu0 %v2854_v1 }
0x1649   :  { %v2853_v45 = vpop.xlane.xlu0 %2852 }
0x164a   :  { %v2857_v47 = vmul.f32 0.03125, %v2853_v45 }
0x164c   :  { %v2859_v62 = vadd.f32 1e-05, %v2857_v47 }
0x164d   :  { %v2856_v49 = vpop.xlane.xlu0 %2855 }
0x164e   :  { %3833 = vrsqrt.f32 %v2859_v62  ;;  %v2858_v46 = vmul.f32 0.03125, %v2856_v49 }
0x1650   :  { %v2860_v50 = vadd.f32 1e-05, %v2858_v46 }
0x1652   :  { %3835 = vrsqrt.f32 %v2860_v50  ;;  %v3751_v50 = vld [vmem:[%s4478_s29 + $0x8] sm:$0xff]  }
0x165b   :  { %v3834_v51 = vpop.eup %3833 }
0x165c   :  { %v2863_v52 = vmul.f32 %v3834_v51, %v2847_v34  ;;  %v3752_v51 = vld [vmem:[%s4478_s29] sm:$0xff]   ;;  %s4328_s29 = smov [#allocation33]  }
0x165d   :  { %s3174_s25 = sshll.u32 %s4328_s29, 4  ;;  %s3175_s25 = int_to_ptr.vmem [resolvable:$true] %s3174_s25 }
0x165e   :  { %v2871_v56 = vmul.f32 %v3313_v53, %v2863_v52  ;;  %s4227_s26 = scalar_lea.vmem %s3175_s25, 256  ;;  %p4232_p12 = scmp.lt.s32.totalorder %s3175_s25, %s3175_s25 }
0x165f   :  { %v3836_v54 = vpop.eup %3835  ;;  %p4228_p11 = scmp.ne.s32.totalorder %s3175_s25, %s4227_s26  ;;  %p4233_p13 = scmp.lt.s32.totalorder %s4227_s26, %s4227_s26 }
0x1660   :  { %v2864_v55 = vmul.f32 %v3836_v54, %v2848_v37  ;;  %v2879_v60 = vadd.f32 %v3314_v57, %v2871_v56 }
0x1661   :  { %p4234_p0 = por %p4233_p13, %p4232_p12 }
0x1662   :  { %v2872_v58 = vmul.f32 %v3313_v53, %v2864_v55 }
0x1663   :  { %p4235_p1 = pnand %p4234_p0, %p4228_p11 }
0x1664   :  { %v2880_v61 = vadd.f32 %v3314_v57, %v2872_v58 }
0x1666   :  { %v2881_v2 = vpack.c.bf16 %v2880_v61, %v2879_v60  ;;  %v3325_v61 = vld [vmem:[#allocation30] ss:$0 sm:$0xff] }
0x1668   :  { %3639 = vmatmul.mubr.msk.bf16.vlgmr.msra.gmra.mxu1 %vm365_vm0, %v2881_v2 }
0x1669   :  { %3658 = vmatprep.mubr.msk.bf16.mxu1 %vm4321_vm1, %v4320_v16  ;;  %3655 = vmatpush3.bf16.msra.mxu1 %v3751_v50 }
0x166a   :  { %3656 = vmatprep.subr.bf16.mxu1 %v4320_v16 }
0x166d   :  { %3657 = vmatpush3.bf16.msra.mxu1 %v3752_v51 }
0x1728   :  { %v2942_v43 = vpop.f32.mrf.mxu1 }
0x1729   :  { %v2943_v9 = vadd.f32 %v3315_v48, %v2942_v43 }
0x172a   :  { %v3640_v10 = vpop.f32.mrf.mxu1 }
0x172b   :  { %v2949_v11 = vmul.f32 %v2943_v9, %v2943_v9 }
0x172c   :  { %v2945_v13 = vpop.f32.mrf.mxu1 }
0x172d   :  { %v2951_v14 = vmul.f32 %v2949_v11, %v2943_v9  ;;  %v2946_v15 = vadd.f32 %v3315_v48, %v2945_v13 }
0x172e   :  { %v3641_v17 = vpop.f32.mrf.mxu1 }
0x172f   :  { %v2953_v18 = vmul.f32 0.044715, %v2951_v14  ;;  %v2950_v0 = vmul.f32 %v2946_v15, %v2946_v15 }
0x1731   :  { %v2955_v20 = vadd.f32 %v2953_v18, %v2943_v9  ;;  %v2952_v5 = vmul.f32 %v2950_v0, %v2946_v15 }
0x1733   :  { %v2957_v21 = vmul.f32 0.7978846, %v2955_v20  ;;  %v2954_v22 = vmul.f32 0.044715, %v2952_v5 }
0x1735   :  { %3837 = vtanh.f32 %v2957_v21  ;;  %v2956_v23 = vadd.f32 %v2954_v22, %v2946_v15 }
0x1737   :  { %v2958_v24 = vmul.f32 0.7978846, %v2956_v23 }
0x1739   :  { %3839 = vtanh.f32 %v2958_v24 }
0x1742   :  { %v3838_v25 = vpop.eup %3837 }
0x1743   :  { %v2961_v7 = vadd.f32 1.0, %v3838_v25 }
0x1745   :  { %v2963_v4 = vmul.f32 0.5, %v2961_v7 }
0x1746   :  { %v3840_v8 = vpop.eup %3839 }
0x1747   :  { %v2962_v63 = vadd.f32 1.0, %v3840_v8  ;;  %v2965_v27 = vmul.f32 %v2963_v4, %v2943_v9  ;;  %v3327_v9 = vld [vmem:[%s4483_s5] ss:$0 sm:$0xff] }
0x1749   :  { %v2964_v38 = vmul.f32 0.5, %v2962_v63 }
0x174b   :  { %v2966_v28 = vmul.f32 %v2964_v38, %v2946_v15 }
0x174d   :  { %v2967_v12 = vpack.c.bf16 %v2966_v28, %v2965_v27 }
0x174f   :  { %3651 = vmatmul.mubr.msk.bf16.vlgmr.msra.gmra.mxu0 %vm1657_vm7, %v2967_v12 }
0x180f   :  { %v3037_v30 = vpop.f32.mrf.mxu0 }
0x1810   :  { %v3044_v32 = vadd.f32 %v3037_v30, %v4902_v26 }
0x1811   :  { %v3652_v33 = vpop.f32.mrf.mxu0 }
0x1812   :  { %v3053_v34 = vadd.f32 %v3324_v31, %v3044_v32 }
0x1813   :  { %v3040_v19 = vpop.f32.mrf.mxu0 }
0x1814   :  { %v3045_v35 = vadd.f32 %v3040_v19, %v4907_v29  ;;  %v3057_v36 = vsel %vm365_vm0, %v3053_v34, 0.0 }
0x1815   :  { %3058 = vadd.xlane.f32.xlu0 %v3057_v36  ;;  %v3653_v37 = vpop.f32.mrf.mxu0 }
0x1816   :  { %v3054_v40 = vadd.f32 %v3324_v31, %v3045_v35 }
0x1818   :  { %v3060_v41 = vsel %vm365_vm0, %v3054_v40, 0.0 }
0x1819   :  { %3061 = vadd.xlane.f32.xlu1 %v3060_v41 }
0x189e   :  { %v3059_v1 = vpop.xlane.xlu0 %3058 }
0x189f   :  { %v3063_v44 = vmul.f32 0.03125, %v3059_v1 }
0x18a1   :  { %v3065_v59 = vsub.f32 %v3053_v34, %v3063_v44 }
0x18a2   :  { %v3062_v45 = vpop.xlane.xlu1 %3061 }
0x18a3   :  { %v3064_v26 = vmul.f32 0.03125, %v3062_v45  ;;  %v3067_v47 = vmul.f32 %v3065_v59, %v3065_v59 }
0x18a5   :  { %v3066_v62 = vsub.f32 %v3054_v40, %v3064_v26  ;;  %v3069_v49 = vsel %vm365_vm0, %v3067_v47, 0.0 }
0x18a6   :  { %3070 = vadd.xlane.f32.xlu0 %v3069_v49 }
0x18a7   :  { %v3068_v29 = vmul.f32 %v3066_v62, %v3066_v62 }
0x18a9   :  { %v3072_v46 = vsel %vm365_vm0, %v3068_v29, 0.0 }
0x18aa   :  { %3073 = vadd.xlane.f32.xlu1 %v3072_v46 }
0x192f   :  { %v3071_v52 = vpop.xlane.xlu0 %3070 }
0x1930   :  { %v3075_v53 = vmul.f32 0.03125, %v3071_v52 }
0x1932   :  { %v3077_v54 = vadd.f32 1e-05, %v3075_v53 }
0x1933   :  { %v3074_v55 = vpop.xlane.xlu1 %3073 }
0x1934   :  { %3841 = vrsqrt.f32 %v3077_v54  ;;  %v3076_v56 = vmul.f32 0.03125, %v3074_v55 }
0x1936   :  { %v3078_v57 = vadd.f32 1e-05, %v3076_v56 }
0x1938   :  { %3843 = vrsqrt.f32 %v3078_v57 }
0x1941   :  { %v3842_v58 = vpop.eup %3841 }
0x1942   :  { %v3081_v60 = vmul.f32 %v3842_v58, %v3065_v59 }
0x1944   :  { %v3089_v6 = vmul.f32 %v3325_v61, %v3081_v60 }
0x1945   :  { %v3844_v2 = vpop.eup %3843 }
0x1946   :  { %v3082_v3 = vmul.f32 %v3844_v2, %v3066_v62  ;;  %v3097_v48 = vadd.f32 %v3326_v39, %v3089_v6 }
0x1948   :  { %v3090_v42 = vmul.f32 %v3325_v61, %v3082_v3 }
0x194a   :  { %v3098_v16 = vadd.f32 %v3326_v39, %v3090_v42 }
0x194c   :  { %v3099_v43 = vpack.c.bf16 %v3098_v16, %v3097_v48 }
0x194e   :  { %3659 = vmatmul.mubr.msk.bf16.vlgmr.msra.gmra.mxu1 %vm365_vm0, %v3099_v43 }
0x1a0e   :  { %v3160_v10 = vpop.f32.mrf.mxu1 }
0x1a0f   :  { %v3161_v11 = vadd.f32 %v3327_v9, %v3160_v10 }
0x1a10   :  { %v3660_v13 = vpop.f32.mrf.mxu1 }
0x1a11   :  { %3167 = vst [vmem:[#allocation33] sm:$0xff] %v3161_v11 }
0x1a12   :  { %v3163_v14 = vpop.f32.mrf.mxu1 }
0x1a13   :  { %v3164_v15 = vadd.f32 %v3327_v9, %v3163_v14 }
0x1a14   :  { %v3661_v17 = vpop.f32.mrf.mxu1 }
0x1a15   :  { %3168 = vst [vmem:[#allocation33 + $0x8] sm:$0xff] %v3164_v15 }
0x1a16   :  { %4238 = shalt.err (!%p4235_p1)
}
0x1a17   :  { %s4329_s21 = smov 128  }
0x1a18   :  { %3180 = dma.vmem_to_hbm [thread:$0]  %s3175_s25, 256, %s4488_s27, [#allocation5], %s4329_s21, %s4329_s21, %s4325_s16  }
0x1a19   :  { %4267 = dma.done.wait [#allocation5], 256  }
0x1a1a   :  { %4268 = vsyncadd [#allocation5], 4294967040 }
0x1a1b   :  { %3184 = vsyncpa [#allocation4], 1 }
0x1a1c   :  { %3185 = vsyncpa [#allocation7], 1 }
0x1a1d   :  { %3186 = vsyncpa [#allocation10], 1 }
0x1a1e   :  { %3187 = vsyncpa [#allocation13], 1 }
0x1a1f   :  { %3188 = vsyncpa [#allocation16], 1 }
0x1a20   :  { %3189 = vsyncpa [#allocation19], 1 }
0x1a21   :  { %3190 = vsyncpa [#allocation22], 1 }
0x1a22   :  { %3191 = vsyncpa [#allocation25], 1 }
0x1a23   :  { %3192 = vsyncpa [#allocation28], 1 }
0x1a24   :  { %3193 = vsyncpa [#allocation31], 1 }
0x1a25   :  { %3194 = vsyncpa [#allocation5], 1 }

</bundles_post_ra>
